<compile_context>
chip_gen: v6e
topology: v6e:2x2x1
jax: 0.10.0
libtpu: 0.0.40
codegen_flags: <defaults>
</compile_context>

<pallas_src>
import functools

import jax
import jax.numpy as jnp
from jax import lax
from jax.experimental import pallas as pl
from jax.experimental.pallas import tpu as pltpu


def _round_up(x, m):
    return ((x + m - 1) // m) * m


# ---------------------------------------------------------------------------
# Pallas kernel: in-kernel gathers + masked mean + fused concat-project Linear
# ---------------------------------------------------------------------------
def _nodepair_kernel(html_id_ref,   # (TR, 1)   i32
                     pos_id_ref,    # (TR, 1)   i32
                     xtag_ref,      # (TR, L)   i32
                     xidx_ref,      # (TR, L)   i32
                     xlen_ref,      # (TR, 1)   i32
                     html_tab_ref,  # (Vh, Dh)  bf16   (VMEM-resident)
                     xtag_tab_ref,  # (Vt, Dx)  bf16   (VMEM-resident)
                     xidx_tab_ref,  # (Vi, Dx)  bf16   (VMEM-resident)
                     pos_tab_ref,   # (Vp, Dp)  bf16   (VMEM-resident)
                     w_ref,         # (Dh+Dx+Dp, H) bf16 (VMEM-resident)
                     b_ref,         # (1, H)    f32    (VMEM-resident)
                     out_ref):      # (TR, H)   f32
    TR = out_ref.shape[0]
    L = xtag_ref.shape[1]
    Vh = html_tab_ref.shape[0]
    Vt = xtag_tab_ref.shape[0]
    Vi = xidx_tab_ref.shape[0]
    Vp = pos_tab_ref.shape[0]
    f32 = jnp.float32
    bf16 = jnp.bfloat16

    # --- html / position embedding lookups as one-hot @ table (MXU) --------
    html_ids = html_id_ref[...]                                      # (TR, 1)
    oh_html = (html_ids == lax.broadcasted_iota(jnp.int32, (TR, Vh), 1)).astype(bf16)
    html_emb = jnp.dot(oh_html, html_tab_ref[...],
                       preferred_element_type=f32)                   # (TR, Dh)

    pos_ids = pos_id_ref[...]
    oh_pos = (pos_ids == lax.broadcasted_iota(jnp.int32, (TR, Vp), 1)).astype(bf16)
    pos_emb = jnp.dot(oh_pos, pos_tab_ref[...],
                      preferred_element_type=f32)                    # (TR, Dp)

    # --- xpath encoder: masked histogram over the sequence, then matmul ----
    xtag = xtag_ref[...]                                             # (TR, L)
    xidx = xidx_ref[...]
    step = lax.broadcasted_iota(jnp.int32, (TR, L), 1)
    mask = (step < xlen_ref[...]).astype(f32)                        # (TR, L)

    iota_t = lax.broadcasted_iota(jnp.int32, (TR, Vt), 1)
    iota_i = lax.broadcasted_iota(jnp.int32, (TR, Vi), 1)
    hist_t = jnp.zeros((TR, Vt), f32)
    hist_i = jnp.zeros((TR, Vi), f32)
    for l in range(L):  # L is small & static -> unrolled at trace time
        m_l = mask[:, l:l + 1]
        hist_t = hist_t + m_l * (xtag[:, l:l + 1] == iota_t).astype(f32)
        hist_i = hist_i + m_l * (xidx[:, l:l + 1] == iota_i).astype(f32)

    # hist entries are exact small integers -> bf16 cast is lossless.
    xsum = (jnp.dot(hist_t.astype(bf16), xtag_tab_ref[...],
                    preferred_element_type=f32)
            + jnp.dot(hist_i.astype(bf16), xidx_tab_ref[...],
                      preferred_element_type=f32))                   # (TR, Dx)
    count = jnp.sum(mask, axis=1, keepdims=True)                     # (TR, 1)
    inv = pl.reciprocal(jnp.maximum(count, 1.0), approx=True)        # EUP slot
    xmean = xsum * inv                                               # (TR, Dx)

    # --- concat-project Linear as a single K=128 MXU matmul ----------------
    cat = jnp.concatenate([html_emb, xmean, pos_emb], axis=-1)       # (TR, 128)
    out = jnp.dot(cat, w_ref[...].astype(f32), preferred_element_type=f32)
    out_ref[...] = out + b_ref[...]


# ---------------------------------------------------------------------------
# Wrapper: row-tiled grid, ids go straight to the kernel (no XLA gathers)
# ---------------------------------------------------------------------------
def base_nodepair_encoder_forward(params, htmltag_ids, xpath_tag_ids,
                                  xpath_index, xpath_length, positions,
                                  *, block_rows=512):
    """Returns (B, max_node_num, 768) float32 node embeddings."""
    B, N = htmltag_ids.shape
    L = xpath_tag_ids.shape[-1]
    R = B * N
    H = params["w_cat"].shape[1]

    # Row tile: multiple of 8 sublanes; sized to fit comfortably within the
    # 32 MiB scoped-VMEM budget (safe on v5e/v6e/v7x) with double buffering.
    TR = min(block_rows, _round_up(R, 8))
    R_pad = _round_up(R, TR)
    pad = R_pad - R

    def pad_rows(a):
        return jnp.pad(a, ((0, pad),) + ((0, 0),) * (a.ndim - 1))

    html_ids = pad_rows(htmltag_ids.reshape(R, 1).astype(jnp.int32))
    pos_ids = pad_rows(positions.reshape(R, 1).astype(jnp.int32))
    xtag = pad_rows(xpath_tag_ids.reshape(R, L).astype(jnp.int32))
    xidx = pad_rows(xpath_index.reshape(R, L).astype(jnp.int32))
    xlen = pad_rows(xpath_length.reshape(R, 1).astype(jnp.int32))

    grid = (R_pad // TR,)

    row2 = lambda d: pl.BlockSpec((TR, d), lambda i: (i, 0))
    full = lambda arr: pl.BlockSpec(arr.shape, lambda i: (0, 0))

    out = pl.pallas_call(
        _nodepair_kernel,
        out_shape=jax.ShapeDtypeStruct((R_pad, H), jnp.float32),
        grid=grid,
        in_specs=[
            row2(1),                               # htmltag ids
            row2(1),                               # position ids
            row2(L),                               # xpath tag ids
            row2(L),                               # xpath index ids
            row2(1),                               # xpath lengths
            full(params["html_table"]),            # VMEM-resident tables
            full(params["xpath_tag_table"]),
            full(params["xpath_index_table"]),
            full(params["pos_table"]),
            full(params["w_cat"]),                 # fused (128, 768) weight
            full(params["bias"]),
        ],
        out_specs=pl.BlockSpec((TR, H), lambda i: (i, 0)),
        compiler_params=pltpu.CompilerParams(
            dimension_semantics=("parallel",),     # rows independent -> 2 TCs on v7x
            vmem_limit_bytes=32 * 1024 * 1024,
        ),
    )(html_ids, pos_ids, xtag, xidx, xlen,
      params["html_table"], params["xpath_tag_table"],
      params["xpath_index_table"], params["pos_table"],
      params["w_cat"], params["bias"])

    return out[:R].reshape(B, N, H)


# ---------------------------------------------------------------------------
# Deterministic parameter construction (synthetic, no checkpoint)
# ---------------------------------------------------------------------------
def make_params(key, html_vocab=50, xpath_tag_vocab=60, xpath_index_vocab=20,
                pos_vocab=100, d_html=32, d_xpath=64, d_pos=32, final_dim=768):
    ks = jax.random.split(key, 6)
    s = 0.02
    bf16 = jnp.bfloat16
    return {
        "html_table": (s * jax.random.normal(ks[0], (html_vocab, d_html), jnp.float32)).astype(bf16),
        "xpath_tag_table": (s * jax.random.normal(ks[1], (xpath_tag_vocab, d_xpath), jnp.float32)).astype(bf16),
        "xpath_index_table": (s * jax.random.normal(ks[2], (xpath_index_vocab, d_xpath), jnp.float32)).astype(bf16),
        "pos_table": (s * jax.random.normal(ks[3], (pos_vocab, d_pos), jnp.float32)).astype(bf16),
        # nn.Linear(d_html + d_xpath + d_pos, 768): weight already transposed
        # to (in, out); fused so the kernel runs ONE K=128 matmul.
        "w_cat": (s * jax.random.normal(ks[4], (d_html + d_xpath + d_pos, final_dim), jnp.float32)).astype(bf16),
        "bias": s * jax.random.normal(ks[5], (1, final_dim), jnp.float32),
    }


if __name__ == "__main__":
    key = jax.random.PRNGKey(0)
    kp, k1, k2, k3, k4, k5 = jax.random.split(key, 6)

    B, N, L = 2, 8, 8          # batch, max_node_num, max_xpath_length
    params = make_params(kp)

    htmltag_ids = jax.random.randint(k1, (B, N), 0, 50, dtype=jnp.int32)
    xpath_tag_ids = jax.random.randint(k2, (B, N, L), 0, 60, dtype=jnp.int32)
    xpath_index = jax.random.randint(k3, (B, N, L), 0, 20, dtype=jnp.int32)
    xpath_length = jax.random.randint(k4, (B, N), 1, L + 1, dtype=jnp.int32)
    positions = jax.random.randint(k5, (B, N), 0, 100, dtype=jnp.int32)

    fwd = jax.jit(functools.partial(base_nodepair_encoder_forward, params))
    out = fwd(htmltag_ids, xpath_tag_ids, xpath_index, xpath_length, positions)
    jax.block_until_ready(out)

    # Reference in plain JAX (gather + masked mean + concat + Linear), f32 math
    # on the same bf16-stored parameters.
    ht = params["html_table"].astype(jnp.float32)
    xt = params["xpath_tag_table"].astype(jnp.float32)
    xi = params["xpath_index_table"].astype(jnp.float32)
    pt = params["pos_table"].astype(jnp.float32)
    w = params["w_cat"].astype(jnp.float32)

    html_emb = jnp.take(ht, htmltag_ids.reshape(-1), axis=0)
    xp = (jnp.take(xt, xpath_tag_ids.reshape(-1, L), axis=0)
          + jnp.take(xi, xpath_index.reshape(-1, L), axis=0))
    mask = (jnp.arange(L)[None, :] < xpath_length.reshape(-1)[:, None]).astype(jnp.float32)
    xmean = (xp * mask[:, :, None]).sum(1) / jnp.maximum(mask.sum(1, keepdims=True), 1.0)
    pos_emb = jnp.take(pt, positions.reshape(-1), axis=0)
    cat = jnp.concatenate([html_emb, xmean, pos_emb], axis=-1)
    ref = (cat @ w + params["bias"]).reshape(B, N, -1)

    assert out.shape == (B, N, 768) and out.dtype == jnp.float32
    # approx-reciprocal + MXU f32 rounding only -> tight tolerance still holds
    assert jnp.allclose(out, ref, atol=2e-4, rtol=2e-3), \
        float(jnp.max(jnp.abs(out - ref)))

    print("KERNEL_OK")
</pallas_src>

<mosaic_0001>
module attributes {stable_mosaic.version = 11 : i64} {
  func.func @_nodepair_kernel(%arg0: i32, %arg1: memref<16x1xi32, #tpu.memory_space<vmem>>, %arg2: memref<16x1xi32, #tpu.memory_space<vmem>>, %arg3: memref<16x8xi32, #tpu.memory_space<vmem>>, %arg4: memref<16x8xi32, #tpu.memory_space<vmem>>, %arg5: memref<16x1xi32, #tpu.memory_space<vmem>>, %arg6: memref<50x32xbf16, #tpu.memory_space<vmem>>, %arg7: memref<60x64xbf16, #tpu.memory_space<vmem>>, %arg8: memref<20x64xbf16, #tpu.memory_space<vmem>>, %arg9: memref<100x32xbf16, #tpu.memory_space<vmem>>, %arg10: memref<128x768xbf16, #tpu.memory_space<vmem>>, %arg11: memref<1x768xf32, #tpu.memory_space<vmem>>, %arg12: memref<16x768xf32, #tpu.memory_space<vmem>>) attributes {dimension_semantics = [#tpu.dimension_semantics<parallel>], iteration_bounds = array<i64: 1>, scalar_prefetch = 0 : i64, scratch_operands = 0 : i64, tpu.core_type = #tpu.core_type<tc>, window_params = [{transform_indices = @transform_0, window_bounds = array<i64: 16, 1>}, {transform_indices = @transform_1, window_bounds = array<i64: 16, 1>}, {transform_indices = @transform_2, window_bounds = array<i64: 16, 8>}, {transform_indices = @transform_3, window_bounds = array<i64: 16, 8>}, {transform_indices = @transform_4, window_bounds = array<i64: 16, 1>}, {pipeline_mode = #tpu.pipeline_mode<synchronous>, transform_indices = @transform_5, window_bounds = array<i64: 50, 32>}, {pipeline_mode = #tpu.pipeline_mode<synchronous>, transform_indices = @transform_6, window_bounds = array<i64: 60, 64>}, {pipeline_mode = #tpu.pipeline_mode<synchronous>, transform_indices = @transform_7, window_bounds = array<i64: 20, 64>}, {pipeline_mode = #tpu.pipeline_mode<synchronous>, transform_indices = @transform_8, window_bounds = array<i64: 100, 32>}, {pipeline_mode = #tpu.pipeline_mode<synchronous>, transform_indices = @transform_9, window_bounds = array<i64: 128, 768>}, {pipeline_mode = #tpu.pipeline_mode<synchronous>, transform_indices = @transform_10, window_bounds = array<i64: 1, 768>}, {transform_indices = @transform_11, window_bounds = array<i64: 16, 768>}]} {
    %c0 = arith.constant 0 : index
    %c0_0 = arith.constant 0 : index
    %0 = vector.load %arg1[%c0, %c0_0] : memref<16x1xi32, #tpu.memory_space<vmem>>, vector<16x1xi32>
    %1 = tpu.iota {dimensions = array<i32: 1>} : vector<16x50xi32>
    %2 = vector.broadcast %0 : vector<16x1xi32> to vector<16x50xi32>
    %3 = arith.cmpi eq, %2, %1 : vector<16x50xi32>
    %4 = arith.extui %3 : vector<16x50xi1> to vector<16x50xi32>
    %5 = arith.sitofp %4 : vector<16x50xi32> to vector<16x50xf32>
    %6 = arith.truncf %5 : vector<16x50xf32> to vector<16x50xbf16>
    %c0_1 = arith.constant 0 : index
    %c0_2 = arith.constant 0 : index
    %7 = vector.load %arg6[%c0_1, %c0_2] : memref<50x32xbf16, #tpu.memory_space<vmem>>, vector<50x32xbf16>
    %cst = arith.constant dense<0.000000e+00> : vector<16x32xf32>
    %8 = tpu.matmul %6, %7, %cst {dimension_numbers = #tpu.dot_dimension_numbers<[1], [0], [0], [1], [0, 0, 1, 1], [], []>} : vector<16x50xbf16>, vector<50x32xbf16>, vector<16x32xf32> -> vector<16x32xf32>
    %c0_3 = arith.constant 0 : index
    %c0_4 = arith.constant 0 : index
    %9 = vector.load %arg2[%c0_3, %c0_4] : memref<16x1xi32, #tpu.memory_space<vmem>>, vector<16x1xi32>
    %10 = tpu.iota {dimensions = array<i32: 1>} : vector<16x100xi32>
    %11 = vector.broadcast %9 : vector<16x1xi32> to vector<16x100xi32>
    %12 = arith.cmpi eq, %11, %10 : vector<16x100xi32>
    %13 = arith.extui %12 : vector<16x100xi1> to vector<16x100xi32>
    %14 = arith.sitofp %13 : vector<16x100xi32> to vector<16x100xf32>
    %15 = arith.truncf %14 : vector<16x100xf32> to vector<16x100xbf16>
    %c0_5 = arith.constant 0 : index
    %c0_6 = arith.constant 0 : index
    %16 = vector.load %arg9[%c0_5, %c0_6] : memref<100x32xbf16, #tpu.memory_space<vmem>>, vector<100x32xbf16>
    %cst_7 = arith.constant dense<0.000000e+00> : vector<16x32xf32>
    %17 = tpu.matmul %15, %16, %cst_7 {dimension_numbers = #tpu.dot_dimension_numbers<[1], [0], [0], [1], [0, 0, 1, 1], [], []>} : vector<16x100xbf16>, vector<100x32xbf16>, vector<16x32xf32> -> vector<16x32xf32>
    %c0_8 = arith.constant 0 : index
    %c0_9 = arith.constant 0 : index
    %18 = vector.load %arg3[%c0_8, %c0_9] : memref<16x8xi32, #tpu.memory_space<vmem>>, vector<16x8xi32>
    %c0_10 = arith.constant 0 : index
    %c0_11 = arith.constant 0 : index
    %19 = vector.load %arg4[%c0_10, %c0_11] : memref<16x8xi32, #tpu.memory_space<vmem>>, vector<16x8xi32>
    %20 = tpu.iota {dimensions = array<i32: 1>} : vector<16x8xi32>
    %c0_12 = arith.constant 0 : index
    %c0_13 = arith.constant 0 : index
    %21 = vector.load %arg5[%c0_12, %c0_13] : memref<16x1xi32, #tpu.memory_space<vmem>>, vector<16x1xi32>
    %22 = vector.broadcast %21 : vector<16x1xi32> to vector<16x8xi32>
    %23 = arith.cmpi slt, %20, %22 : vector<16x8xi32>
    %24 = arith.extui %23 : vector<16x8xi1> to vector<16x8xi32>
    %25 = arith.sitofp %24 : vector<16x8xi32> to vector<16x8xf32>
    %26 = tpu.iota {dimensions = array<i32: 1>} : vector<16x60xi32>
    %27 = tpu.iota {dimensions = array<i32: 1>} : vector<16x20xi32>
    %cst_14 = arith.constant 0.000000e+00 : f32
    %28 = vector.broadcast %cst_14 : f32 to vector<16x60xf32>
    %cst_15 = arith.constant 0.000000e+00 : f32
    %29 = vector.broadcast %cst_15 : f32 to vector<16x20xf32>
    %30 = vector.extract_strided_slice %25 {offsets = [0, 0], sizes = [16, 1], strides = [1, 1]} : vector<16x8xf32> to vector<16x1xf32>
    %31 = vector.extract_strided_slice %18 {offsets = [0, 0], sizes = [16, 1], strides = [1, 1]} : vector<16x8xi32> to vector<16x1xi32>
    %32 = vector.broadcast %31 : vector<16x1xi32> to vector<16x60xi32>
    %33 = arith.cmpi eq, %32, %26 : vector<16x60xi32>
    %34 = arith.extui %33 : vector<16x60xi1> to vector<16x60xi32>
    %35 = arith.sitofp %34 : vector<16x60xi32> to vector<16x60xf32>
    %36 = vector.broadcast %30 : vector<16x1xf32> to vector<16x60xf32>
    %37 = arith.mulf %36, %35 : vector<16x60xf32>
    %38 = arith.addf %28, %37 : vector<16x60xf32>
    %39 = vector.extract_strided_slice %19 {offsets = [0, 0], sizes = [16, 1], strides = [1, 1]} : vector<16x8xi32> to vector<16x1xi32>
    %40 = vector.broadcast %39 : vector<16x1xi32> to vector<16x20xi32>
    %41 = arith.cmpi eq, %40, %27 : vector<16x20xi32>
    %42 = arith.extui %41 : vector<16x20xi1> to vector<16x20xi32>
    %43 = arith.sitofp %42 : vector<16x20xi32> to vector<16x20xf32>
    %44 = vector.broadcast %30 : vector<16x1xf32> to vector<16x20xf32>
    %45 = arith.mulf %44, %43 : vector<16x20xf32>
    %46 = arith.addf %29, %45 : vector<16x20xf32>
    %47 = vector.extract_strided_slice %25 {offsets = [0, 1], sizes = [16, 1], strides = [1, 1]} : vector<16x8xf32> to vector<16x1xf32>
    %48 = vector.extract_strided_slice %18 {offsets = [0, 1], sizes = [16, 1], strides = [1, 1]} : vector<16x8xi32> to vector<16x1xi32>
    %49 = vector.broadcast %48 : vector<16x1xi32> to vector<16x60xi32>
    %50 = arith.cmpi eq, %49, %26 : vector<16x60xi32>
    %51 = arith.extui %50 : vector<16x60xi1> to vector<16x60xi32>
    %52 = arith.sitofp %51 : vector<16x60xi32> to vector<16x60xf32>
    %53 = vector.broadcast %47 : vector<16x1xf32> to vector<16x60xf32>
    %54 = arith.mulf %53, %52 : vector<16x60xf32>
    %55 = arith.addf %38, %54 : vector<16x60xf32>
    %56 = vector.extract_strided_slice %19 {offsets = [0, 1], sizes = [16, 1], strides = [1, 1]} : vector<16x8xi32> to vector<16x1xi32>
    %57 = vector.broadcast %56 : vector<16x1xi32> to vector<16x20xi32>
    %58 = arith.cmpi eq, %57, %27 : vector<16x20xi32>
    %59 = arith.extui %58 : vector<16x20xi1> to vector<16x20xi32>
    %60 = arith.sitofp %59 : vector<16x20xi32> to vector<16x20xf32>
    %61 = vector.broadcast %47 : vector<16x1xf32> to vector<16x20xf32>
    %62 = arith.mulf %61, %60 : vector<16x20xf32>
    %63 = arith.addf %46, %62 : vector<16x20xf32>
    %64 = vector.extract_strided_slice %25 {offsets = [0, 2], sizes = [16, 1], strides = [1, 1]} : vector<16x8xf32> to vector<16x1xf32>
    %65 = vector.extract_strided_slice %18 {offsets = [0, 2], sizes = [16, 1], strides = [1, 1]} : vector<16x8xi32> to vector<16x1xi32>
    %66 = vector.broadcast %65 : vector<16x1xi32> to vector<16x60xi32>
    %67 = arith.cmpi eq, %66, %26 : vector<16x60xi32>
    %68 = arith.extui %67 : vector<16x60xi1> to vector<16x60xi32>
    %69 = arith.sitofp %68 : vector<16x60xi32> to vector<16x60xf32>
    %70 = vector.broadcast %64 : vector<16x1xf32> to vector<16x60xf32>
    %71 = arith.mulf %70, %69 : vector<16x60xf32>
    %72 = arith.addf %55, %71 : vector<16x60xf32>
    %73 = vector.extract_strided_slice %19 {offsets = [0, 2], sizes = [16, 1], strides = [1, 1]} : vector<16x8xi32> to vector<16x1xi32>
    %74 = vector.broadcast %73 : vector<16x1xi32> to vector<16x20xi32>
    %75 = arith.cmpi eq, %74, %27 : vector<16x20xi32>
    %76 = arith.extui %75 : vector<16x20xi1> to vector<16x20xi32>
    %77 = arith.sitofp %76 : vector<16x20xi32> to vector<16x20xf32>
    %78 = vector.broadcast %64 : vector<16x1xf32> to vector<16x20xf32>
    %79 = arith.mulf %78, %77 : vector<16x20xf32>
    %80 = arith.addf %63, %79 : vector<16x20xf32>
    %81 = vector.extract_strided_slice %25 {offsets = [0, 3], sizes = [16, 1], strides = [1, 1]} : vector<16x8xf32> to vector<16x1xf32>
    %82 = vector.extract_strided_slice %18 {offsets = [0, 3], sizes = [16, 1], strides = [1, 1]} : vector<16x8xi32> to vector<16x1xi32>
    %83 = vector.broadcast %82 : vector<16x1xi32> to vector<16x60xi32>
    %84 = arith.cmpi eq, %83, %26 : vector<16x60xi32>
    %85 = arith.extui %84 : vector<16x60xi1> to vector<16x60xi32>
    %86 = arith.sitofp %85 : vector<16x60xi32> to vector<16x60xf32>
    %87 = vector.broadcast %81 : vector<16x1xf32> to vector<16x60xf32>
    %88 = arith.mulf %87, %86 : vector<16x60xf32>
    %89 = arith.addf %72, %88 : vector<16x60xf32>
    %90 = vector.extract_strided_slice %19 {offsets = [0, 3], sizes = [16, 1], strides = [1, 1]} : vector<16x8xi32> to vector<16x1xi32>
    %91 = vector.broadcast %90 : vector<16x1xi32> to vector<16x20xi32>
    %92 = arith.cmpi eq, %91, %27 : vector<16x20xi32>
    %93 = arith.extui %92 : vector<16x20xi1> to vector<16x20xi32>
    %94 = arith.sitofp %93 : vector<16x20xi32> to vector<16x20xf32>
    %95 = vector.broadcast %81 : vector<16x1xf32> to vector<16x20xf32>
    %96 = arith.mulf %95, %94 : vector<16x20xf32>
    %97 = arith.addf %80, %96 : vector<16x20xf32>
    %98 = vector.extract_strided_slice %25 {offsets = [0, 4], sizes = [16, 1], strides = [1, 1]} : vector<16x8xf32> to vector<16x1xf32>
    %99 = vector.extract_strided_slice %18 {offsets = [0, 4], sizes = [16, 1], strides = [1, 1]} : vector<16x8xi32> to vector<16x1xi32>
    %100 = vector.broadcast %99 : vector<16x1xi32> to vector<16x60xi32>
    %101 = arith.cmpi eq, %100, %26 : vector<16x60xi32>
    %102 = arith.extui %101 : vector<16x60xi1> to vector<16x60xi32>
    %103 = arith.sitofp %102 : vector<16x60xi32> to vector<16x60xf32>
    %104 = vector.broadcast %98 : vector<16x1xf32> to vector<16x60xf32>
    %105 = arith.mulf %104, %103 : vector<16x60xf32>
    %106 = arith.addf %89, %105 : vector<16x60xf32>
    %107 = vector.extract_strided_slice %19 {offsets = [0, 4], sizes = [16, 1], strides = [1, 1]} : vector<16x8xi32> to vector<16x1xi32>
    %108 = vector.broadcast %107 : vector<16x1xi32> to vector<16x20xi32>
    %109 = arith.cmpi eq, %108, %27 : vector<16x20xi32>
    %110 = arith.extui %109 : vector<16x20xi1> to vector<16x20xi32>
    %111 = arith.sitofp %110 : vector<16x20xi32> to vector<16x20xf32>
    %112 = vector.broadcast %98 : vector<16x1xf32> to vector<16x20xf32>
    %113 = arith.mulf %112, %111 : vector<16x20xf32>
    %114 = arith.addf %97, %113 : vector<16x20xf32>
    %115 = vector.extract_strided_slice %25 {offsets = [0, 5], sizes = [16, 1], strides = [1, 1]} : vector<16x8xf32> to vector<16x1xf32>
    %116 = vector.extract_strided_slice %18 {offsets = [0, 5], sizes = [16, 1], strides = [1, 1]} : vector<16x8xi32> to vector<16x1xi32>
    %117 = vector.broadcast %116 : vector<16x1xi32> to vector<16x60xi32>
    %118 = arith.cmpi eq, %117, %26 : vector<16x60xi32>
    %119 = arith.extui %118 : vector<16x60xi1> to vector<16x60xi32>
    %120 = arith.sitofp %119 : vector<16x60xi32> to vector<16x60xf32>
    %121 = vector.broadcast %115 : vector<16x1xf32> to vector<16x60xf32>
    %122 = arith.mulf %121, %120 : vector<16x60xf32>
    %123 = arith.addf %106, %122 : vector<16x60xf32>
    %124 = vector.extract_strided_slice %19 {offsets = [0, 5], sizes = [16, 1], strides = [1, 1]} : vector<16x8xi32> to vector<16x1xi32>
    %125 = vector.broadcast %124 : vector<16x1xi32> to vector<16x20xi32>
    %126 = arith.cmpi eq, %125, %27 : vector<16x20xi32>
    %127 = arith.extui %126 : vector<16x20xi1> to vector<16x20xi32>
    %128 = arith.sitofp %127 : vector<16x20xi32> to vector<16x20xf32>
    %129 = vector.broadcast %115 : vector<16x1xf32> to vector<16x20xf32>
    %130 = arith.mulf %129, %128 : vector<16x20xf32>
    %131 = arith.addf %114, %130 : vector<16x20xf32>
    %132 = vector.extract_strided_slice %25 {offsets = [0, 6], sizes = [16, 1], strides = [1, 1]} : vector<16x8xf32> to vector<16x1xf32>
    %133 = vector.extract_strided_slice %18 {offsets = [0, 6], sizes = [16, 1], strides = [1, 1]} : vector<16x8xi32> to vector<16x1xi32>
    %134 = vector.broadcast %133 : vector<16x1xi32> to vector<16x60xi32>
    %135 = arith.cmpi eq, %134, %26 : vector<16x60xi32>
    %136 = arith.extui %135 : vector<16x60xi1> to vector<16x60xi32>
    %137 = arith.sitofp %136 : vector<16x60xi32> to vector<16x60xf32>
    %138 = vector.broadcast %132 : vector<16x1xf32> to vector<16x60xf32>
    %139 = arith.mulf %138, %137 : vector<16x60xf32>
    %140 = arith.addf %123, %139 : vector<16x60xf32>
    %141 = vector.extract_strided_slice %19 {offsets = [0, 6], sizes = [16, 1], strides = [1, 1]} : vector<16x8xi32> to vector<16x1xi32>
    %142 = vector.broadcast %141 : vector<16x1xi32> to vector<16x20xi32>
    %143 = arith.cmpi eq, %142, %27 : vector<16x20xi32>
    %144 = arith.extui %143 : vector<16x20xi1> to vector<16x20xi32>
    %145 = arith.sitofp %144 : vector<16x20xi32> to vector<16x20xf32>
    %146 = vector.broadcast %132 : vector<16x1xf32> to vector<16x20xf32>
    %147 = arith.mulf %146, %145 : vector<16x20xf32>
    %148 = arith.addf %131, %147 : vector<16x20xf32>
    %149 = vector.extract_strided_slice %25 {offsets = [0, 7], sizes = [16, 1], strides = [1, 1]} : vector<16x8xf32> to vector<16x1xf32>
    %150 = vector.extract_strided_slice %18 {offsets = [0, 7], sizes = [16, 1], strides = [1, 1]} : vector<16x8xi32> to vector<16x1xi32>
    %151 = vector.broadcast %150 : vector<16x1xi32> to vector<16x60xi32>
    %152 = arith.cmpi eq, %151, %26 : vector<16x60xi32>
    %153 = arith.extui %152 : vector<16x60xi1> to vector<16x60xi32>
    %154 = arith.sitofp %153 : vector<16x60xi32> to vector<16x60xf32>
    %155 = vector.broadcast %149 : vector<16x1xf32> to vector<16x60xf32>
    %156 = arith.mulf %155, %154 : vector<16x60xf32>
    %157 = arith.addf %140, %156 : vector<16x60xf32>
    %158 = vector.extract_strided_slice %19 {offsets = [0, 7], sizes = [16, 1], strides = [1, 1]} : vector<16x8xi32> to vector<16x1xi32>
    %159 = vector.broadcast %158 : vector<16x1xi32> to vector<16x20xi32>
    %160 = arith.cmpi eq, %159, %27 : vector<16x20xi32>
    %161 = arith.extui %160 : vector<16x20xi1> to vector<16x20xi32>
    %162 = arith.sitofp %161 : vector<16x20xi32> to vector<16x20xf32>
    %163 = vector.broadcast %149 : vector<16x1xf32> to vector<16x20xf32>
    %164 = arith.mulf %163, %162 : vector<16x20xf32>
    %165 = arith.addf %148, %164 : vector<16x20xf32>
    %166 = arith.truncf %157 : vector<16x60xf32> to vector<16x60xbf16>
    %c0_16 = arith.constant 0 : index
    %c0_17 = arith.constant 0 : index
    %167 = vector.load %arg7[%c0_16, %c0_17] : memref<60x64xbf16, #tpu.memory_space<vmem>>, vector<60x64xbf16>
    %cst_18 = arith.constant dense<0.000000e+00> : vector<16x64xf32>
    %168 = tpu.matmul %166, %167, %cst_18 {dimension_numbers = #tpu.dot_dimension_numbers<[1], [0], [0], [1], [0, 0, 1, 1], [], []>} : vector<16x60xbf16>, vector<60x64xbf16>, vector<16x64xf32> -> vector<16x64xf32>
    %169 = arith.truncf %165 : vector<16x20xf32> to vector<16x20xbf16>
    %c0_19 = arith.constant 0 : index
    %c0_20 = arith.constant 0 : index
    %170 = vector.load %arg8[%c0_19, %c0_20] : memref<20x64xbf16, #tpu.memory_space<vmem>>, vector<20x64xbf16>
    %cst_21 = arith.constant dense<0.000000e+00> : vector<16x64xf32>
    %171 = tpu.matmul %169, %170, %cst_21 {dimension_numbers = #tpu.dot_dimension_numbers<[1], [0], [0], [1], [0, 0, 1, 1], [], []>} : vector<16x20xbf16>, vector<20x64xbf16>, vector<16x64xf32> -> vector<16x64xf32>
    %172 = arith.addf %168, %171 : vector<16x64xf32>
    %cst_22 = arith.constant dense<0.000000e+00> : vector<16xf32>
    %173 = vector.multi_reduction <add>, %25, %cst_22 [1] : vector<16x8xf32> to vector<16xf32>
    %174 = vector.shape_cast %173 : vector<16xf32> to vector<16x1xf32>
    %cst_23 = arith.constant 1.000000e+00 : f32
    %175 = vector.broadcast %cst_23 : f32 to vector<16x1xf32>
    %176 = arith.maximumf %174, %175 : vector<16x1xf32>
    %177 = tpu.reciprocal %176 {approx = true} : vector<16x1xf32> -> vector<16x1xf32>
    %178 = vector.broadcast %177 : vector<16x1xf32> to vector<16x64xf32>
    %179 = arith.mulf %172, %178 : vector<16x64xf32>
    %180 = tpu.concatenate %8, %179, %17 in 1 : vector<16x32xf32>, vector<16x64xf32>, vector<16x32xf32> -> vector<16x128xf32>
    %c0_24 = arith.constant 0 : index
    %c0_25 = arith.constant 0 : index
    %181 = vector.load %arg10[%c0_24, %c0_25] : memref<128x768xbf16, #tpu.memory_space<vmem>>, vector<128x768xbf16>
    %182 = arith.extf %181 : vector<128x768xbf16> to vector<128x768xf32>
    %cst_26 = arith.constant dense<0.000000e+00> : vector<16x768xf32>
    %183 = tpu.matmul %180, %182, %cst_26 {dimension_numbers = #tpu.dot_dimension_numbers<[1], [0], [0], [1], [0, 0, 1, 1], [], []>} : vector<16x128xf32>, vector<128x768xf32>, vector<16x768xf32> -> vector<16x768xf32>
    %c0_27 = arith.constant 0 : index
    %c0_28 = arith.constant 0 : index
    %184 = vector.load %arg11[%c0_27, %c0_28] : memref<1x768xf32, #tpu.memory_space<vmem>>, vector<1x768xf32>
    %185 = vector.broadcast %184 : vector<1x768xf32> to vector<16x768xf32>
    %186 = arith.addf %183, %185 : vector<16x768xf32>
    %c0_29 = arith.constant 0 : index
    %c0_30 = arith.constant 0 : index
    %187 = vector.load %arg12[%c0_29, %c0_30] : memref<16x768xf32, #tpu.memory_space<vmem>>, vector<16x768xf32>
    tpu.vector_store %arg12[%c0_29, %c0_30], %186 {strides = array<i32>} : memref<16x768xf32, #tpu.memory_space<vmem>>, vector<16x768xf32>,
    return
  }
  func.func @transform_0(%arg0: i32) -> (i32, i32) {
    %c0_i32 = arith.constant 0 : i32
    %c0_i32_0 = arith.constant 0 : i32
    return %arg0, %c0_i32 : i32, i32
  }
  func.func @transform_1(%arg0: i32) -> (i32, i32) {
    %c0_i32 = arith.constant 0 : i32
    %c0_i32_0 = arith.constant 0 : i32
    return %arg0, %c0_i32 : i32, i32
  }
  func.func @transform_2(%arg0: i32) -> (i32, i32) {
    %c0_i32 = arith.constant 0 : i32
    %c0_i32_0 = arith.constant 0 : i32
    return %arg0, %c0_i32 : i32, i32
  }
  func.func @transform_3(%arg0: i32) -> (i32, i32) {
    %c0_i32 = arith.constant 0 : i32
    %c0_i32_0 = arith.constant 0 : i32
    return %arg0, %c0_i32 : i32, i32
  }
  func.func @transform_4(%arg0: i32) -> (i32, i32) {
    %c0_i32 = arith.constant 0 : i32
    %c0_i32_0 = arith.constant 0 : i32
    return %arg0, %c0_i32 : i32, i32
  }
  func.func @transform_5(%arg0: i32) -> (i32, i32) {
    %c0_i32 = arith.constant 0 : i32
    %c0_i32_0 = arith.constant 0 : i32
    %c0_i32_1 = arith.constant 0 : i32
    return %c0_i32, %c0_i32_0 : i32, i32
  }
  func.func @transform_6(%arg0: i32) -> (i32, i32) {
    %c0_i32 = arith.constant 0 : i32
    %c0_i32_0 = arith.constant 0 : i32
    %c0_i32_1 = arith.constant 0 : i32
    return %c0_i32, %c0_i32_0 : i32, i32
  }
  func.func @transform_7(%arg0: i32) -> (i32, i32) {
    %c0_i32 = arith.constant 0 : i32
    %c0_i32_0 = arith.constant 0 : i32
    %c0_i32_1 = arith.constant 0 : i32
    return %c0_i32, %c0_i32_0 : i32, i32
  }
  func.func @transform_8(%arg0: i32) -> (i32, i32) {
    %c0_i32 = arith.constant 0 : i32
    %c0_i32_0 = arith.constant 0 : i32
    %c0_i32_1 = arith.constant 0 : i32
    return %c0_i32, %c0_i32_0 : i32, i32
  }
  func.func @transform_9(%arg0: i32) -> (i32, i32) {
    %c0_i32 = arith.constant 0 : i32
    %c0_i32_0 = arith.constant 0 : i32
    %c0_i32_1 = arith.constant 0 : i32
    return %c0_i32, %c0_i32_0 : i32, i32
  }
  func.func @transform_10(%arg0: i32) -> (i32, i32) {
    %c0_i32 = arith.constant 0 : i32
    %c0_i32_0 = arith.constant 0 : i32
    %c0_i32_1 = arith.constant 0 : i32
    return %c0_i32, %c0_i32_0 : i32, i32
  }
  func.func @transform_11(%arg0: i32) -> (i32, i32) {
    %c0_i32 = arith.constant 0 : i32
    %c0_i32_0 = arith.constant 0 : i32
    return %arg0, %c0_i32 : i32, i32
  }
}

</mosaic_0001>

<bundles_post_ra>
// kernel: base_nodepair_encoder_forward.1
= control target key start
LH: loop header
LB: loop body
LE: loop exit
PB: predicated region body
PF: predicated region fallthrough
CT: control target
= control target key end

     0   :  { %16 = vsyncpa [#allocation3], 0  ;;  %s2187_s0 = inlined_call_operand.vmem [shape: s32[16,1], index: 0, kind: input, shape index: {}]   ;;  %s2188_s1 = inlined_call_operand.vmem [shape: s32[16,1], index: 1, kind: input, shape index: {}]   ;;  %s2189_s2 = inlined_call_operand.vmem [shape: s32[16,8], index: 2, kind: input, shape index: {}]   ;;  %s2190_s3 = inlined_call_operand.hbm [shape: s32[16,8], index: 3, kind: input, shape index: {}]   ;;  %s2191_s4 = inlined_call_operand.vmem [shape: s32[16,1], index: 4, kind: input, shape index: {}]   ;;  %s2192_s5 = inlined_call_operand.hbm [shape: bf16[50,32], index: 5, kind: input, shape index: {}]   ;;  %s2193_s6 = inlined_call_operand.hbm [shape: bf16[60,64], index: 6, kind: input, shape index: {}]   ;;  %s2194_s7 = inlined_call_operand.hbm [shape: bf16[20,64], index: 7, kind: input, shape index: {}]   ;;  %s2195_s8 = inlined_call_operand.vmem [shape: bf16[100,32], index: 8, kind: input, shape index: {}]   ;;  %s2196_s9 = inlined_call_operand.hbm [shape: bf16[128,768], index: 9, kind: input, shape index: {}]   ;;  %s2197_s10 = inlined_call_operand.vmem [shape: f32[1,768], index: 10, kind: input, shape index: {}]   ;;  %s2198_s11 = inlined_call_operand.hbm [shape: f32[16,768], index: 11, kind: output, shape index: {}]  }
   0x1   :  { %17 = vsyncpa [#allocation6], 0 }
   0x2   :  { %18 = vsyncpa [#allocation9], 0 }
   0x3   :  { %19 = vsyncpa [#allocation4], 0  ;;  %s1657_s17 = smov [#allocation5]  }
   0x4   :  { %s45_s18 = sshll.u32 %s1657_s17, 4  ;;  %s46_s18 = int_to_ptr.vmem [resolvable:$true] %s45_s18 }
   0x5   :  { %s1537_s19 = scalar_lea.vmem %s46_s18, 448  ;;  %p1542_p1 = scmp.lt.s32.totalorder %s46_s18, %s46_s18 }
   0x6   :  { %p1538_p0 = scmp.ne.s32.totalorder %s46_s18, %s1537_s19  ;;  %p1543_p2 = scmp.lt.s32.totalorder %s1537_s19, %s1537_s19 }
   0x8   :  { %p1544_p3 = por %p1543_p2, %p1542_p1 }
   0xa   :  { %p1545_p4 = pnand %p1544_p3, %p1538_p0 }
   0xc   :  { %1548 = shalt.err (!%p1545_p4)
}
   0xd   :  { %s1658_s20 = smov 64   ;;  %s1659_s21 = smov 4  }
   0xe   :  { %51 = dma.hbm_to_vmem [thread:$0]  %s2192_s5, 448, %s46_s18, [#allocation6], %s1658_s20, %s1658_s20, %s1659_s21  }
   0xf   :  { %s1660_s24 = smov [#allocation8]   ;;  %s1661_s26 = smov [#allocation2]  }
  0x10   :  { %s69_s25 = sshll.u32 %s1660_s24, 4  ;;  %s31_s27 = sshll.u32 %s1661_s26, 4  ;;  %s70_s25 = int_to_ptr.vmem [resolvable:$true] %s69_s25  ;;  %s32_s27 = int_to_ptr.vmem [resolvable:$true] %s31_s27 }
  0x11   :  { %s1557_s28 = scalar_lea.vmem %s70_s25, 192  ;;  %p1562_p6 = scmp.lt.s32.totalorder %s70_s25, %s70_s25 }
  0x12   :  { %p1558_p5 = scmp.ne.s32.totalorder %s70_s25, %s1557_s28  ;;  %p1563_p7 = scmp.lt.s32.totalorder %s1557_s28, %s1557_s28 }
  0x14   :  { %p1564_p8 = por %p1563_p7, %p1562_p6 }
  0x16   :  { %p1565_p9 = pnand %p1564_p8, %p1558_p5 }
  0x18   :  { %1568 = shalt.err (!%p1565_p9)
}
  0x19   :  { %75 = dma.hbm_to_vmem [thread:$0]  %s2194_s7, 192, %s70_s25, [#allocation9], %s1658_s20, %s1658_s20, %s1659_s21  }
  0x1a   :  { %s1577_s5 = scalar_lea.vmem %s32_s27, 256  ;;  %p1582_p11 = scmp.lt.s32.totalorder %s32_s27, %s32_s27 }
  0x1b   :  { %p1578_p10 = scmp.ne.s32.totalorder %s32_s27, %s1577_s5  ;;  %p1583_p12 = scmp.lt.s32.totalorder %s1577_s5, %s1577_s5 }
  0x1d   :  { %p1584_p13 = por %p1583_p12, %p1582_p11 }
  0x1f   :  { %p1585_p0 = pnand %p1584_p13, %p1578_p10 }
  0x21   :  { %1588 = shalt.err (!%p1585_p0)
}
  0x22   :  { %s1662_s12 = smov 128   ;;  %s1663_s13 = smov 8  }
  0x23   :  { %37 = dma.hbm_to_vmem [thread:$0]  %s2190_s3, 256, %s32_s27, [#allocation3], %s1662_s12, %s1662_s12, %s1663_s13  }
  0x24   :  { %s1664_s16 = smov [#allocation7]   ;;  %s1665_s18 = smov [#allocation10]  }
  0x25   :  { %s57_s17 = sshll.u32 %s1664_s16, 4  ;;  %s83_s19 = sshll.u32 %s1665_s18, 4  ;;  %s58_s17 = int_to_ptr.vmem [resolvable:$true] %s57_s17  ;;  %s84_s19 = int_to_ptr.vmem [resolvable:$true] %s83_s19 }
  0x26   :  { %s1597_s7 = scalar_lea.vmem %s58_s17, 512  ;;  %p1602_p2 = scmp.lt.s32.totalorder %s58_s17, %s58_s17 }
  0x27   :  { %p1598_p1 = scmp.ne.s32.totalorder %s58_s17, %s1597_s7  ;;  %p1603_p3 = scmp.lt.s32.totalorder %s1597_s7, %s1597_s7 }
  0x29   :  { %p1604_p4 = por %p1603_p3, %p1602_p2 }
  0x2b   :  { %p1605_p5 = pnand %p1604_p4, %p1598_p1 }
  0x2d   :  { %1608 = shalt.err (!%p1605_p5)
}
  0x2e   :  { %63 = dma.hbm_to_vmem [thread:$0]  %s2193_s6, 512, %s58_s17, [#allocation6], %s1658_s20, %s1658_s20, %s1659_s21  }
  0x2f   :  { %s1617_s3 = scalar_lea.vmem %s84_s19, 6144  ;;  %p1622_p7 = scmp.lt.s32.totalorder %s84_s19, %s84_s19 }
  0x30   :  { %p1618_p6 = scmp.ne.s32.totalorder %s84_s19, %s1617_s3  ;;  %p1623_p8 = scmp.lt.s32.totalorder %s1617_s3, %s1617_s3 }
  0x32   :  { %p1624_p9 = por %p1623_p8, %p1622_p7 }
  0x34   :  { %p1625_p10 = pnand %p1624_p9, %p1618_p6 }
  0x36   :  { %1628 = shalt.err (!%p1625_p10)
}
  0x37   :  { %s1666_s24 = smov 384   ;;  %s1667_s25 = smov 24  }
  0x38   :  { %89 = dma.hbm_to_vmem [thread:$0]  %s2196_s9, 6144, %s84_s19, [#allocation9], %s1666_s24, %s1666_s24, %s1667_s25  }
  0x39   :  { %1649 = dma.done.wait [#allocation3], 256  }
  0x3a   :  { %1650 = vsyncadd [#allocation3], 4294967040 }
  0x3b   :  { %1651 = dma.done.wait [#allocation6], 960  }
  0x3c   :  { %1652 = vsyncadd [#allocation6], 4294966336 }
  0x3d   :  { %1653 = dma.done.wait [#allocation9], 6336  }
  0x3e   :  { %1654 = vsyncadd [#allocation9], 4294960960  ;;  %v1668_v0 = vmov 0   ;;  %v1669_v1 = vmov 0.0   ;;  %v322_v2 = vld [vmem:[%s2191_s4] sm:$0xff]  ;;  %v323_v4 = vld [vmem:[%s2191_s4 + $0x8] sm:$0xff]  ;;  %v110_v22 = vlaneseq }
  0x3f   :  { %1429 = vset.pattern.permute.xlu0 %v1668_v0  ;;  %1430 = vset.pattern.permute.xlu1 %v1668_v0  ;;  %v320_v3 = vld [vmem:[#allocation2] sm:$0xff]  ;;  %v321_v5 = vld [vmem:[#allocation2 + $0x8] sm:$0xff]  ;;  %v1670_v6 = vmov 1   ;;  %v1671_v7 = vmov 3   ;;  %v1672_v8 = vmov 2   ;;  %v1673_v9 = vmov 4  }
  0x40   :  { %1353 = vmatprep.subr.bf16.mxu0 %v1669_v1  ;;  %1365 = vmatprep.subr.bf16.mxu1 %v1669_v1  ;;  %v1674_v10 = vmov 5   ;;  %v1675_v11 = vmov 6   ;;  %v108_v12 = vld [vmem:[%s2187_s0] sm:$0xff]  ;;  %v1676_v13 = vmov 7   ;;  %v109_v14 = vld [vmem:[%s2187_s0 + $0x8] sm:$0xff]  ;;  %vm157_vm0 = vcmask 1040384  }
  0x41   :  { %325 = vperm.xlu0 %1429, %v322_v2   ;;  %363 = vperm.xlu1 %1430, %v320_v3   ;;  %v1795_v15 = vld [vmem:[%s2189_s2 + $0x8] sm:$0xff]  ;;  %v1805_v16 = vld [vmem:[%s2189_s2] sm:$0xff]  ;;  %vm1677_vm1 = vmmov 0   ;;  %v1510_v20 = vld [vmem:[#allocation5 + $0x8] sm:$0xff]   ;;  %v1827_v23 = vand.u32 127, %v110_v22  ;;  %vm153_vm6 = vcmask 408576  }
  0x42   :  { %v1508_v17 = vld [vmem:[#allocation5 + $0x18] ss:$0 sps:$4 sm:$0x11]   ;;  %1361 = vmatprep.mubr.msk.bf16.mxu0 %vm1677_vm1, %v1669_v1  ;;  %1379 = vmatprep.mubr.msk.bf16.mxu1 %vm1677_vm1, %v1669_v1  ;;  %v1509_v19 = vld [vmem:[#allocation5 + $0x10] sm:$0xff]   ;;  %v1511_v21 = vld [vmem:[#allocation5] sm:$0xff]   ;;  %vm273_vm7 = vcmask 1041408  }
  0x43   :  { %v159_v18 = vsel %vm157_vm0, %v1508_v17, 0  ;;  %v202_v36 = vld [vmem:[%s2188_s1] sm:$0xff]  ;;  %v1512_v41 = vld [vmem:[%s2195_s8 + $0x30] ss:$0 sps:$4 sm:$0x33]   ;;  %v1514_v45 = vld [vmem:[%s2195_s8 + $0x28] sm:$0xff]  }
  0x44   :  { %1354 = vmatpush3.bf16.msra.mxu0 %v159_v18  ;;  %v1513_v42 = vld [vmem:[#allocation8 + $0x8] ss:$0 sps:$4 sm:$0x33]   ;;  %v275_v43 = vsel %vm273_vm7, %v1512_v41, 0  ;;  %v1515_v46 = vld [vmem:[#allocation8] sm:$0xff]   ;;  %v1516_v47 = vld [vmem:[%s2195_s8 + $0x20] sm:$0xff]  }
  0x45   :  { %328 = vperm.xlu0 %1429, %v323_v4   ;;  %366 = vperm.xlu1 %1430, %v321_v5   ;;  %v685_v44 = vsel %vm273_vm7, %v1513_v42, 0  ;;  %v1518_v48 = vld [vmem:[%s2195_s8 + $0x18] sm:$0xff]   ;;  %v1520_v49 = vld [vmem:[%s2195_s8 + $0x10] sm:$0xff]   ;;  %v1522_v50 = vld [vmem:[%s2195_s8 + $0x8] sm:$0xff]   ;;  %vm800_vm8 = vcmask 64512  }
  0x46   :  { %1355 = vmatprep.subr.bf16.mxu0 %v1669_v1  ;;  %1366 = vmatpush3.bf16.msra.mxu1 %v275_v43  ;;  %v203_v52 = vld [vmem:[%s2188_s1 + $0x8] sm:$0xff]  ;;  %v1524_v53 = vld [vmem:[%s2195_s8] sm:$0xff]   ;;  %s1678_s1 = smov 96   ;;  %s1679_s8 = smov 32  }
  0x47   :  { %1367 = vmatprep.subr.bf16.mxu1 %v1669_v1 }
  0x48   :  { %1356 = vmatpush3.bf16.msra.mxu0 %v1509_v19 }
  0x49   :  { %1431 = vset.pattern.permute.xlu1 %v1670_v6  ;;  %1434 = vset.pattern.permute.xlu0 %v1671_v7 }
  0x4a   :  { %406 = vperm.xlu1 %1431, %v321_v5   ;;  %486 = vperm.xlu0 %1434, %v321_v5  }
  0x4b   :  { %1357 = vmatprep.subr.bf16.mxu0 %v1669_v1  ;;  %1368 = vmatpush3.bf16.msra.mxu1 %v1514_v45 }
  0x4c   :  { %1358 = vmatpush3.bf16.msra.mxu0 %v1510_v20  ;;  %1369 = vmatprep.subr.bf16.mxu1 %v1669_v1 }
  0x4d   :  { %1359 = vmatprep.subr.bf16.mxu0 %v1669_v1 }
  0x4e   :  { %1432 = vset.pattern.permute.xlu1 %v1672_v8  ;;  %1436 = vset.pattern.permute.xlu0 %v1673_v9 }
  0x4f   :  { %443 = vperm.xlu1 %1432, %v320_v3   ;;  %526 = vperm.xlu0 %1436, %v321_v5  }
  0x50   :  { %1360 = vmatpush3.bf16.msra.mxu0 %v1511_v21  ;;  %1370 = vmatpush3.bf16.msra.mxu1 %v1516_v47 }
  0x51   :  { %1383 = vmatprep.subr.bf16.mxu0 %v1669_v1  ;;  %1371 = vmatprep.subr.bf16.mxu1 %v1669_v1 }
  0x53   :  { %1433 = vset.pattern.permute.xlu1 %v1671_v7  ;;  %1439 = vset.pattern.permute.xlu0 %v1674_v10 }
  0x54   :  { %483 = vperm.xlu1 %1433, %v320_v3   ;;  %566 = vperm.xlu0 %1439, %v321_v5  }
  0x55   :  { %1372 = vmatpush3.bf16.msra.mxu1 %v1518_v48 }
  0x56   :  { %1373 = vmatprep.subr.bf16.mxu1 %v1669_v1 }
  0x58   :  { %1435 = vset.pattern.permute.xlu1 %v1673_v9  ;;  %1441 = vset.pattern.permute.xlu0 %v1675_v11 }
  0x59   :  { %523 = vperm.xlu1 %1435, %v320_v3   ;;  %606 = vperm.xlu0 %1441, %v321_v5  }
  0x5a   :  { %1374 = vmatpush3.bf16.msra.mxu1 %v1520_v49 }
  0x5b   :  { %1375 = vmatprep.subr.bf16.mxu1 %v1669_v1 }
  0x5d   :  { %1437 = vset.pattern.permute.xlu1 %v1668_v0  ;;  %1443 = vset.pattern.permute.xlu0 %v1676_v13 }
  0x5e   :  { %113 = vperm.xlu1 %1437, %v108_v12   ;;  %646 = vperm.xlu0 %1443, %v321_v5  }
  0x5f   :  { %1376 = vmatpush3.bf16.msra.mxu1 %v1522_v50 }
  0x60   :  { %1377 = vmatprep.subr.bf16.mxu1 %v1669_v1 }
  0x62   :  { %116 = vperm.xlu1 %1437, %v109_v14   ;;  %1445 = vset.pattern.permute.xlu0 %v1668_v0 }
  0x63   :  { %340 = vperm.xlu0 %1445, %v1795_v15   ;;  %1378 = vmatpush3.bf16.msra.mxu1 %v1524_v53 }
  0x66   :  { %1438 = vset.pattern.permute.xlu1 %v1674_v10 }
  0x67   :  { %563 = vperm.xlu1 %1438, %v320_v3   ;;  %1446 = vset.pattern.permute.xlu0 %v1672_v8 }
  0x68   :  { %446 = vperm.xlu0 %1446, %v321_v5  }
  0x6b   :  { %1440 = vset.pattern.permute.xlu1 %v1675_v11 }
  0x6c   :  { %603 = vperm.xlu1 %1440, %v320_v3   ;;  %419 = vperm.xlu0 %1446, %v1805_v16  }
  0x70   :  { %1442 = vset.pattern.permute.xlu1 %v1676_v13  ;;  %1448 = vset.pattern.permute.xlu0 %v1670_v6 }
  0x71   :  { %643 = vperm.xlu1 %1442, %v320_v3   ;;  %403 = vperm.xlu0 %1448, %v320_v3  }
  0x75   :  { %1444 = vset.pattern.permute.xlu1 %v1668_v0 }
  0x76   :  { %337 = vperm.xlu1 %1444, %v1805_v16  }
  0x7a   :  { %1447 = vset.pattern.permute.xlu1 %v1670_v6 }
  0x7b   :  { %379 = vperm.xlu1 %1447, %v1805_v16  }
  0x7f   :  { %382 = vperm.xlu1 %1447, %v1795_v15  }
  0x83   :  { %1449 = vset.pattern.permute.xlu1 %v1672_v8 }
  0x84   :  { %422 = vperm.xlu1 %1449, %v1795_v15  }
  0x88   :  { %1450 = vset.pattern.permute.xlu1 %v1671_v7 }
  0x89   :  { %459 = vperm.xlu1 %1450, %v1805_v16  }
  0x8d   :  { %1451 = vset.pattern.permute.xlu1 %v1668_v0 }
  0xbc   :  { %v326_v24 = vpop.permute.xlu0 %325  ;;  %v1829_v25 = vpop.permute.xlu1 %363 }
  0xbd   :  { %vm330_vm2 = vcmp.lt.s32.totalorder %v1827_v23, %v326_v24  ;;  %vm368_vm12 = vcmp.eq.s32.totalorder %v1829_v25, %v1827_v23 }
  0xbe   :  { %v1836_v28 = vsel %vm330_vm2, 1.0, %v1669_v1  ;;  %v1294_v20 = vsel %vm368_vm12, 1.0, %v1669_v1 }
  0xbf   :  { %v801_v61 = vsel %vm800_vm8, %v1836_v28, 0.0 }
  0xc0   :  { %v329_v26 = vpop.permute.xlu0 %328  ;;  %v1832_v27 = vpop.permute.xlu1 %366 }
  0xc1   :  { %vm331_vm3 = vcmp.lt.s32.totalorder %v1827_v23, %v329_v26  ;;  %vm369_vm10 = vcmp.eq.s32.totalorder %v1832_v27, %v1827_v23 }
  0xc2   :  { %v1839_v29 = vsel %vm331_vm3, 1.0, %v1669_v1 }
  0xc3   :  { %v1457_v30 = vpack.i.bf16 %v1839_v29, %v1836_v28  ;;  %v804_v51 = vsel %vm800_vm8, %v1839_v29, 0.0 }
  0xc5   :  { %1458 = vperm.xlu0 %1448, %v1457_v30   ;;  %1453 = vperm.xlu1 %1451, %v1457_v30   ;;  %v1843_v31 = vpop.permute.xlu1 %406  ;;  %v1919_v54 = vpop.permute.xlu0 %486 }
  0xc6   :  { %vm409_vm9 = vcmp.eq.s32.totalorder %v1843_v31, %v1827_v23  ;;  %vm489_vm2 = vcmp.eq.s32.totalorder %v1919_v54, %v1827_v23 }
  0xc7   :  { %v1307_v48 = vsel %vm489_vm2, 1.0, %v1669_v1 }
  0xc9   :  { %1474 = vset.pattern.permute.xlu0 %v1673_v9  ;;  %1462 = vset.pattern.permute.xlu1 %v1672_v8 }
  0xca   :  { %1476 = vperm.xlu0 %1474, %v1457_v30   ;;  %1464 = vperm.xlu1 %1462, %v1457_v30   ;;  %v1847_v32 = vpop.permute.xlu1 %443  ;;  %v1921_v55 = vpop.permute.xlu0 %526 }
  0xcb   :  { %vm448_vm13 = vcmp.eq.s32.totalorder %v1847_v32, %v1827_v23  ;;  %vm529_vm3 = vcmp.eq.s32.totalorder %v1921_v55, %v1827_v23 }
  0xcc   :  { %v1302_v28 = vsel %vm448_vm13, 1.0, %v1669_v1  ;;  %vm755_vm13 = vcmask 1045504  }
  0xce   :  { %1480 = vset.pattern.permute.xlu0 %v1671_v7  ;;  %1468 = vset.pattern.permute.xlu1 %v1671_v7 }
  0xcf   :  { %462 = vperm.xlu0 %1480, %v1795_v15   ;;  %1470 = vperm.xlu1 %1468, %v1457_v30   ;;  %v1852_v33 = vpop.permute.xlu1 %483  ;;  %v1925_v57 = vpop.permute.xlu0 %566 }
  0xd0   :  { %vm488_vm14 = vcmp.eq.s32.totalorder %v1852_v33, %v1827_v23 }
  0xd3   :  { %1482 = vset.pattern.permute.xlu0 %v1674_v10  ;;  %1481 = vset.pattern.permute.xlu1 %v1673_v9 }
  0xd4   :  { %539 = vperm.xlu0 %1482, %v1805_v16   ;;  %499 = vperm.xlu1 %1481, %v1805_v16   ;;  %v1858_v34 = vpop.permute.xlu1 %523  ;;  %v1929_v59 = vpop.permute.xlu0 %606 }
  0xd5   :  { %vm528_vm15 = vcmp.eq.s32.totalorder %v1858_v34, %v1827_v23  ;;  %vm609_vm7 = vcmp.eq.s32.totalorder %v1929_v59, %v1827_v23 }
  0xd6   :  { %v1310_v33 = vsel %vm528_vm15, 1.0, %v1669_v1 }
  0xd8   :  { %1503 = vset.pattern.permute.xlu0 %v1675_v11  ;;  %502 = vperm.xlu1 %1481, %v1795_v15  }
  0xd9   :  { %582 = vperm.xlu0 %1503, %v1795_v15   ;;  %v114_v35 = vpop.permute.xlu1 %113  ;;  %v1935_v62 = vpop.permute.xlu0 %646 }
  0xda   :  { %vm118_vm4 = vcmp.eq.s32.totalorder %v114_v35, %v1827_v23  ;;  %vm649_vm8 = vcmp.eq.s32.totalorder %v1935_v62, %v1827_v23 }
  0xdb   :  { %v1273_v37 = vsel %vm118_vm4, 1.0, %v1669_v1  ;;  %vm569_vm4 = vcmp.eq.s32.totalorder %v1925_v57, %v1827_v23 }
  0xdc   :  { %1483 = vset.pattern.permute.xlu1 %v1674_v10  ;;  %v1315_v55 = vsel %vm569_vm4, 1.0, %v1669_v1 }
  0xdd   :  { %1505 = vset.pattern.permute.xlu0 %v1668_v0  ;;  %1485 = vperm.xlu1 %1483, %v1457_v30   ;;  %v117_v38 = vpop.permute.xlu1 %116 }
  0xde   :  { %205 = vperm.xlu0 %1505, %v202_v36   ;;  %vm119_vm5 = vcmp.eq.s32.totalorder %v117_v38, %v1827_v23  ;;  %v1306_v38 = vsel %vm488_vm14, 1.0, %v1669_v1 }
  0xdf   :  { %v1274_v39 = vsel %vm119_vm5, 1.0, %v1669_v1 }
  0xe0   :  { %v124_v40 = vpack.c.bf16 %v1274_v39, %v1273_v37 }
  0xe1   :  { %1489 = vset.pattern.permute.xlu1 %v1675_v11 }
  0xe2   :  { %1491 = vperm.xlu1 %1489, %v1457_v30   ;;  %1362 = vmatmul.mubr.msk.bf16.vlgmr.msra.gmra.mxu0 %vm153_vm6, %v124_v40  ;;  %v1923_v56 = vpop.permute.xlu1 %563 }
  0xe3   :  { %1387 = vmatprep.mubr.msk.bf16.mxu0 %vm1677_vm1, %v1669_v1  ;;  %1507 = vset.pattern.permute.xlu0 %v1676_v13  ;;  %vm568_vm5 = vcmp.eq.s32.totalorder %v1923_v56, %v1827_v23 }
  0xe4   :  { %1384 = vmatpush3.bf16.msra.mxu0 %v685_v44 }
  0xe5   :  { %1385 = vmatprep.subr.bf16.mxu0 %v1669_v1 }
  0xe6   :  { %1495 = vset.pattern.permute.xlu1 %v1676_v13 }
  0xe7   :  { %1497 = vperm.xlu1 %1495, %v1457_v30   ;;  %v1927_v58 = vpop.permute.xlu1 %603 }
  0xe8   :  { %1386 = vmatpush3.bf16.msra.mxu0 %v1515_v46  ;;  %vm608_vm6 = vcmp.eq.s32.totalorder %v1927_v58, %v1827_v23 }
  0xe9   :  { %1391 = vmatprep.subr.bf16.mxu0 %v1669_v1 }
  0xeb   :  { %1501 = vset.pattern.permute.xlu1 %v1674_v10 }
  0xec   :  { %542 = vperm.xlu1 %1501, %v1795_v15   ;;  %v1931_v60 = vpop.permute.xlu1 %643 }
  0xf0   :  { %1502 = vset.pattern.permute.xlu1 %v1675_v11 }
  0xf1   :  { %579 = vperm.xlu1 %1502, %v1805_v16   ;;  %v1937_v63 = vpop.permute.xlu1 %337 }
  0xf2   :  { %vm342_vm12 = vcmp.eq.s32.totalorder %v1937_v63, %v1827_v23 }
  0xf5   :  { %1504 = vset.pattern.permute.xlu1 %v1676_v13  ;;  %v1299_v13 = vsel %vm409_vm9, 1.0, %v1669_v1 }
  0xf6   :  { %619 = vperm.xlu1 %1504, %v1805_v16   ;;  %v1941_v2 = vpop.permute.xlu1 %379  ;;  %v1295_v16 = vsel %vm369_vm10, 1.0, %v1669_v1 }
  0xf7   :  { %vm384_vm14 = vcmp.eq.s32.totalorder %v1941_v2, %v1827_v23 }
  0xfa   :  { %622 = vperm.xlu1 %1504, %v1795_v15   ;;  %v1943_v4 = vpop.permute.xlu1 %382 }
  0xfb   :  { %vm385_vm15 = vcmp.eq.s32.totalorder %v1943_v4, %v1827_v23  ;;  %v1296_v4 = vsel %vm384_vm14, 1.0, %v1669_v1  ;;  %vm751_vm14 = vcmask 490496  }
  0xfd   :  { %805 = vadd.xlane.f32.xlu0 %v804_v51 }
  0xfe   :  { %1506 = vset.pattern.permute.xlu1 %v1668_v0  ;;  %v1939_v0 = vpop.permute.xlu0 %340 }
  0xff   :  { %208 = vperm.xlu1 %1506, %v203_v52   ;;  %v1945_v5 = vpop.permute.xlu1 %422  ;;  %vm343_vm9 = vcmp.eq.s32.totalorder %v1939_v0, %v1827_v23  ;;  %v1319_v0 = vsel %vm609_vm7, 1.0, %v1669_v1 }
 0x102   :  { %v447_v3 = vpop.permute.xlu0 %446 }
 0x103   :  { %vm449_vm0 = vcmp.eq.s32.totalorder %v447_v3, %v1827_v23  ;;  %v1314_v3 = vsel %vm568_vm5, 1.0, %v1669_v1 }
 0x104   :  { %v1949_v7 = vpop.permute.xlu1 %459  ;;  %v1303_v45 = vsel %vm449_vm0, 1.0, %v1669_v1  ;;  %vm425_vm0 = vcmp.eq.s32.totalorder %v1945_v5, %v1827_v23  ;;  %v1297_v5 = vsel %vm385_vm15, 1.0, %v1669_v1  ;;  %vm269_vm15 = vcmask 818176  }
 0x105   :  { %vm464_vm5 = vcmp.eq.s32.totalorder %v1949_v7, %v1827_v23 }
 0x106   :  { %v1947_v6 = vpop.permute.xlu0 %419 }
 0x107   :  { %vm424_vm10 = vcmp.eq.s32.totalorder %v1947_v6, %v1827_v23 }
 0x10a   :  { %v404_v8 = vpop.permute.xlu0 %403 }
 0x10b   :  { %vm408_vm11 = vcmp.eq.s32.totalorder %v404_v8, %v1827_v23 }
 0x10c   :  { %v1298_v17 = vsel %vm408_vm11, 1.0, %v1669_v1  ;;  %vm648_vm11 = vcmp.eq.s32.totalorder %v1931_v60, %v1827_v23 }
 0x123   :  { %802 = vadd.xlane.f32.xlu1 %v801_v61  ;;  %v1311_v61 = vsel %vm529_vm3, 1.0, %v1669_v1  ;;  %vm680_vm3 = vcmask 162816  }
 0x140   :  { %v1956_v9 = vpop.permute.xlu0 %1458  ;;  %v1958_v10 = vpop.permute.xlu1 %1453 }
 0x141   :  { %v1461_v11 = vunpack.i.h.bf16 %v1956_v9  ;;  %v1456_v12 = vunpack.i.h.bf16 %v1958_v10  ;;  %v1460_v14 = vunpack.i.l.bf16 %v1956_v9  ;;  %v1455_v15 = vunpack.i.l.bf16 %v1958_v10 }
 0x143   :  { %v415_v18 = vmul.f32 %v1461_v11, %v1299_v13  ;;  %v375_v19 = vmul.f32 %v1456_v12, %v1295_v16  ;;  %v414_v24 = vmul.f32 %v1460_v14, %v1298_v17  ;;  %v374_v26 = vmul.f32 %v1455_v15, %v1294_v20 }
 0x144   :  { %v1318_v16 = vsel %vm608_vm6, 1.0, %v1669_v1  ;;  %v1323_v17 = vsel %vm649_vm8, 1.0, %v1669_v1  ;;  %v1293_v20 = vsel %vm343_vm9, 1.0, %v1669_v1 }
 0x145   :  { %v1974_v21 = vpop.permute.xlu1 %1464  ;;  %v417_v25 = vadd.f32 %v415_v18, %v375_v19  ;;  %v1984_v29 = vpop.permute.xlu0 %1476  ;;  %v416_v30 = vadd.f32 %v414_v24, %v374_v26  ;;  %v1300_v24 = vsel %vm424_vm10, 1.0, %v1669_v1  ;;  %v1517_v26 = vld [vmem:[#allocation7 + $0x18] sm:$0x3f]   ;;  %v359_v63 = vmul.f32 %v1456_v12, %v1293_v20 }
 0x146   :  { %v1466_v27 = vunpack.i.l.bf16 %v1974_v21  ;;  %v1478_v35 = vunpack.i.l.bf16 %v1984_v29  ;;  %v1467_v43 = vunpack.i.h.bf16 %v1974_v21  ;;  %v1479_v51 = vunpack.i.h.bf16 %v1984_v29 }
 0x147   :  { %v757_v2 = vsel %vm755_vm13, %v1517_v26, 0 }
 0x148   :  { %v454_v31 = vmul.f32 %v1466_v27, %v1302_v28  ;;  %v534_v41 = vmul.f32 %v1478_v35, %v1310_v33  ;;  %v455_v47 = vmul.f32 %v1467_v43, %v1303_v45  ;;  %v535_v58 = vmul.f32 %v1479_v51, %v1311_v61 }
 0x149   :  { %v399_v61 = vmul.f32 %v1461_v11, %v1297_v5  ;;  %v438_v9 = vmul.f32 %v1466_v27, %v1300_v24 }
 0x14a   :  { %v1990_v32 = vpop.permute.xlu1 %1470  ;;  %v456_v36 = vadd.f32 %v454_v31, %v416_v30  ;;  %v457_v52 = vadd.f32 %v455_v47, %v417_v25  ;;  %v463_v28 = vpop.permute.xlu0 %462 }
 0x14b   :  { %v1472_v37 = vunpack.i.l.bf16 %v1990_v32  ;;  %v1473_v46 = vunpack.i.h.bf16 %v1990_v32  ;;  %vm465_vm2 = vcmp.eq.s32.totalorder %v463_v28, %v1827_v23  ;;  %v401_v12 = vadd.f32 %v399_v61, %v359_v63 }
 0x14d   :  { %v494_v39 = vmul.f32 %v1472_v37, %v1306_v38  ;;  %v495_v50 = vmul.f32 %v1473_v46, %v1307_v48  ;;  %v1322_v38 = vsel %vm648_vm11, 1.0, %v1669_v1 }
 0x14f   :  { %v2000_v40 = vpop.permute.xlu1 %499  ;;  %v496_v42 = vadd.f32 %v494_v39, %v456_v36  ;;  %v497_v56 = vadd.f32 %v495_v50, %v457_v52  ;;  %v540_v45 = vpop.permute.xlu0 %539  ;;  %v1301_v52 = vsel %vm425_vm0, 1.0, %v1669_v1  ;;  %vm829_vm0 = vcmask 261120  }
 0x150   :  { %v439_v11 = vmul.f32 %v1467_v43, %v1301_v52  ;;  %vm504_vm6 = vcmp.eq.s32.totalorder %v2000_v40, %v1827_v23  ;;  %vm544_vm8 = vcmp.eq.s32.totalorder %v540_v45, %v1827_v23  ;;  %v1304_v40 = vsel %vm464_vm5, 1.0, %v1669_v1 }
 0x151   :  { %v536_v34 = vadd.f32 %v534_v41, %v496_v42  ;;  %v537_v18 = vadd.f32 %v535_v58, %v497_v56  ;;  %v1308_v27 = vsel %vm504_vm6, 1.0, %v1669_v1 }
 0x153   :  { %v2006_v44 = vpop.permute.xlu1 %502 }
 0x154   :  { %vm505_vm4 = vcmp.eq.s32.totalorder %v2006_v44, %v1827_v23  ;;  %v583_v43 = vpop.permute.xlu0 %582 }
 0x155   :  { %v1309_v10 = vsel %vm505_vm4, 1.0, %v1669_v1 }
 0x158   :  { %v2015_v49 = vpop.permute.xlu1 %1485 }
 0x159   :  { %v1488_v53 = vunpack.i.h.bf16 %v2015_v49  ;;  %v1487_v54 = vunpack.i.l.bf16 %v2015_v49 }
 0x15b   :  { %v575_v59 = vmul.f32 %v1488_v53, %v1315_v55  ;;  %v574_v62 = vmul.f32 %v1487_v54, %v1314_v3  ;;  %v398_v55 = vmul.f32 %v1460_v14, %v1296_v4  ;;  %v1305_v3 = vsel %vm465_vm2, 1.0, %v1669_v1 }
 0x15c   :  { %v479_v14 = vmul.f32 %v1473_v46, %v1305_v3  ;;  %v478_v46 = vmul.f32 %v1472_v37, %v1304_v40  ;;  %v1521_v37 = vld [vmem:[#allocation7 + $0x8] sm:$0xff]   ;;  %vm832_vm2 = vcmask 785408  }
 0x15d   :  { %v2036_v57 = vpop.permute.xlu1 %1491  ;;  %v576_v60 = vadd.f32 %v574_v62, %v536_v34  ;;  %v577_v30 = vadd.f32 %v575_v59, %v537_v18  ;;  %v1292_v34 = vsel %vm342_vm12, 1.0, %v1669_v1  ;;  %v441_v59 = vadd.f32 %v439_v11, %v401_v12  ;;  %v874_v3 = vld [vmem:[#allocation10 + $0x138] sm:$0xff] }
 0x15e   :  { %v1494_v8 = vunpack.i.h.bf16 %v2036_v57  ;;  %v1493_v13 = vunpack.i.l.bf16 %v2036_v57  ;;  %v358_v56 = vmul.f32 %v1455_v15, %v1292_v34  ;;  %v1519_v15 = vld [vmem:[#allocation7 + $0x10] sm:$0xff]   ;;  %v519_v62 = vmul.f32 %v1479_v51, %v1309_v10 }
 0x15f   :  { %v518_v18 = vmul.f32 %v1478_v35, %v1308_v27 }
 0x160   :  { %v615_v6 = vmul.f32 %v1494_v8, %v1319_v0  ;;  %v614_v19 = vmul.f32 %v1493_v13, %v1318_v16  ;;  %v400_v21 = vadd.f32 %v398_v55, %v358_v56  ;;  %v1312_v0 = vsel %vm544_vm8, 1.0, %v1669_v1  ;;  %v878_v56 = vld [vmem:[#allocation10 + $0x158] sm:$0xff] }
 0x161   :  { %v558_v24 = vmul.f32 %v1487_v54, %v1312_v0  ;;  %v969_v10 = vunpack.c.l.bf16 %v878_v56  ;;  %v970_v12 = vunpack.c.h.bf16 %v878_v56  ;;  %v865_v0 = vld [vmem:[#allocation10 + $0xf0] sm:$0xff] }
 0x162   :  { %v2064_v25 = vpop.permute.xlu1 %1497  ;;  %v616_v39 = vadd.f32 %v614_v19, %v576_v60  ;;  %v617_v33 = vadd.f32 %v615_v6, %v577_v30  ;;  %v440_v16 = vadd.f32 %v438_v9, %v400_v21  ;;  %v206_v60 = vpop.permute.xlu0 %205  ;;  %v1523_v30 = vld [vmem:[#allocation7] sm:$0xff]   ;;  %v961_v21 = vunpack.c.l.bf16 %v874_v3 }
 0x163   :  { %v1500_v31 = vunpack.i.h.bf16 %v2064_v25  ;;  %v1499_v36 = vunpack.i.l.bf16 %v2064_v25  ;;  %vm210_vm12 = vcmp.eq.s32.totalorder %v206_v60, %v1827_v23 }
 0x164   :  { %v480_v19 = vadd.f32 %v478_v46, %v440_v16  ;;  %v1280_v57 = vsel %vm210_vm12, 1.0, %v1669_v1 }
 0x165   :  { %v655_v41 = vmul.f32 %v1500_v31, %v1323_v17  ;;  %v654_v42 = vmul.f32 %v1499_v36, %v1322_v38  ;;  %v481_v17 = vadd.f32 %v479_v14, %v441_v59  ;;  %v871_v14 = vld [vmem:[#allocation10 + $0x120] sm:$0xff] }
 0x166   :  { %v520_v26 = vadd.f32 %v518_v18, %v480_v19  ;;  %v956_v59 = vunpack.c.h.bf16 %v871_v14  ;;  %v863_v19 = vld [vmem:[#allocation10 + $0xe0] sm:$0xff] }
 0x167   :  { %v656_v47 = vadd.f32 %v654_v42, %v616_v39  ;;  %v657_v48 = vadd.f32 %v655_v41, %v617_v33  ;;  %v543_v50 = vpop.permute.xlu1 %542  ;;  %v521_v20 = vadd.f32 %v519_v62, %v481_v17  ;;  %v955_v62 = vunpack.c.l.bf16 %v871_v14  ;;  %v866_v17 = vld [vmem:[#allocation10 + $0xf8] sm:$0xff]  ;;  %v841_v14 = vld [vmem:[#allocation10 + $0x30] sm:$0xff] }
 0x168   :  { %vm545_vm7 = vcmp.eq.s32.totalorder %v543_v50, %v1827_v23  ;;  %v560_v39 = vadd.f32 %v558_v24, %v520_v26  ;;  %v877_v50 = vld [vmem:[#allocation10 + $0x150] sm:$0xff]  ;;  %v946_v24 = vunpack.c.h.bf16 %v866_v17  ;;  %v859_v26 = vld [vmem:[#allocation10 + $0xc0] sm:$0xff]  ;;  %v940_v60 = vunpack.c.h.bf16 %v863_v19 }
 0x169   :  { %v667_v58 = vpack.c.bf16 %v657_v48, %v656_v47  ;;  %v1313_v44 = vsel %vm545_vm7, 1.0, %v1669_v1  ;;  %v880_v48 = vld [vmem:[#allocation10 + $0x168] sm:$0xff]  ;;  %v967_v11 = vunpack.c.l.bf16 %v877_v50  ;;  %v968_v9 = vunpack.c.h.bf16 %v877_v50  ;;  %v847_v50 = vld [vmem:[#allocation10 + $0x60] sm:$0xff] }
 0x16a   :  { %v559_v32 = vmul.f32 %v1488_v53, %v1313_v44  ;;  %v973_v52 = vunpack.c.l.bf16 %v880_v48  ;;  %v974_v61 = vunpack.c.h.bf16 %v880_v48  ;;  %v869_v44 = vld [vmem:[#allocation10 + $0x110] sm:$0xff] }
 0x16b   :  { %1388 = vmatmul.mubr.msk.bf16.vlgmr.msra.gmra.mxu0 %vm680_vm3, %v667_v58  ;;  %v875_v58 = vld [vmem:[#allocation10 + $0x140] sm:$0xff] }
 0x16c   :  { %v580_v7 = vpop.permute.xlu1 %579  ;;  %1392 = vmatpush3.bf16.msra.mxu0 %v757_v2  ;;  %1399 = vmatprep.mubr.msk.bf16.mxu0 %vm1677_vm1, %v1669_v1  ;;  %vm585_vm1 = vcmp.eq.s32.totalorder %v583_v43, %v1827_v23  ;;  %v561_v53 = vadd.f32 %v559_v32, %v521_v20  ;;  %v964_v40 = vunpack.c.h.bf16 %v875_v58  ;;  %v963_v27 = vunpack.c.l.bf16 %v875_v58  ;;  %v868_v43 = vld [vmem:[#allocation10 + $0x108] sm:$0xff]  ;;  %v845_v58 = vld [vmem:[#allocation10 + $0x50] sm:$0xff] }
 0x16d   :  { %1393 = vmatprep.subr.bf16.mxu0 %v1669_v1  ;;  %vm584_vm9 = vcmp.eq.s32.totalorder %v580_v7, %v1827_v23  ;;  %v1317_v29 = vsel %vm585_vm1, 1.0, %v1669_v1  ;;  %v872_v7 = vld [vmem:[#allocation10 + $0x128] sm:$0xff]  ;;  %1011 = vmatprep.subr.mxu1 %v974_v61  ;;  %v950_v18 = vunpack.c.h.bf16 %v868_v43  ;;  %v952_v32 = vunpack.c.h.bf16 %v869_v44 }
 0x16e   :  { %v1316_v51 = vsel %vm584_vm9, 1.0, %v1669_v1  ;;  %v599_v49 = vmul.f32 %v1494_v8, %v1317_v29  ;;  %v958_v46 = vunpack.c.h.bf16 %v872_v7  ;;  %v957_v16 = vunpack.c.l.bf16 %v872_v7  ;;  %v842_v7 = vld [vmem:[#allocation10 + $0x38] sm:$0xff] }
 0x16f   :  { %v598_v28 = vmul.f32 %v1493_v13, %v1316_v51  ;;  %v951_v51 = vunpack.c.l.bf16 %v869_v44  ;;  %v944_v20 = vunpack.c.h.bf16 %v865_v0  ;;  %v943_v29 = vunpack.c.l.bf16 %v865_v0  ;;  %v839_v44 = vld [vmem:[#allocation10 + $0x20] sm:$0xff] }
 0x170   :  { %1394 = vmatpush3.bf16.msra.mxu0 %v1519_v15  ;;  %v601_v41 = vadd.f32 %v599_v49, %v561_v53  ;;  %v962_v15 = vunpack.c.h.bf16 %v874_v3  ;;  %v860_v53 = vld [vmem:[#allocation10 + $0xc8] sm:$0xff]  ;;  %v857_v49 = vld [vmem:[#allocation10 + $0xb0] sm:$0xff]  ;;  %v835_v0 = vld [vmem:[#allocation10] sm:$0xff] }
 0x171   :  { %v620_v6 = vpop.permute.xlu1 %619  ;;  %1395 = vmatprep.subr.bf16.mxu0 %v1669_v1  ;;  %v600_v13 = vadd.f32 %v598_v28, %v560_v39  ;;  %v856_v39 = vld [vmem:[#allocation10 + $0xa8] sm:$0xff] }
 0x172   :  { %vm624_vm10 = vcmp.eq.s32.totalorder %v620_v6, %v1827_v23  ;;  %v862_v6 = vld [vmem:[#allocation10 + $0xd8] sm:$0xff]  ;;  %v844_v3 = vld [vmem:[#allocation10 + $0x48] sm:$0xff] }
 0x173   :  { %v1320_v35 = vsel %vm624_vm10, 1.0, %v1669_v1  ;;  %v938_v28 = vunpack.c.h.bf16 %v862_v6 }
 0x174   :  { %1396 = vmatpush3.bf16.msra.mxu0 %v1521_v37  ;;  %v638_v54 = vmul.f32 %v1499_v36, %v1320_v35  ;;  %v949_v37 = vunpack.c.l.bf16 %v868_v43  ;;  %v945_v35 = vunpack.c.l.bf16 %v866_v17  ;;  %v838_v43 = vld [vmem:[#allocation10 + $0x18] sm:$0xff] }
 0x175   :  { %v623_v38 = vpop.permute.xlu1 %622  ;;  %1397 = vmatprep.subr.bf16.mxu0 %v1669_v1  ;;  %v890_v17 = vunpack.c.h.bf16 %v838_v43 }
 0x176   :  { %vm625_vm11 = vcmp.eq.s32.totalorder %v623_v38, %v1827_v23  ;;  %v640_v34 = vadd.f32 %v638_v54, %v600_v13  ;;  %v939_v38 = vunpack.c.l.bf16 %v863_v19  ;;  %v932_v54 = vunpack.c.h.bf16 %v859_v26 }
 0x177   :  { %v1321_v33 = vsel %vm625_vm11, 1.0, %v1669_v1  ;;  %v931_v13 = vunpack.c.l.bf16 %v859_v26 }
 0x178   :  { %v639_v42 = vmul.f32 %v1500_v31, %v1321_v33  ;;  %1398 = vmatpush3.bf16.msra.mxu0 %v1523_v30  ;;  %v937_v30 = vunpack.c.l.bf16 %v862_v6  ;;  %v934_v33 = vunpack.c.h.bf16 %v860_v53  ;;  %v883_v6 = vunpack.c.l.bf16 %v835_v0 }
 0x17a   :  { %v641_v2 = vadd.f32 %v639_v42, %v601_v41  ;;  %v209_v8 = vpop.permute.xlu1 %208  ;;  %v933_v41 = vunpack.c.l.bf16 %v860_v53  ;;  %v853_v42 = vld [vmem:[#allocation10 + $0x90] sm:$0xff] }
 0x17b   :  { %vm211_vm13 = vcmp.eq.s32.totalorder %v209_v8, %v1827_v23  ;;  %v881_v23 = vld [vmem:[#allocation10 + $0x170] sm:$0xff]  ;;  %v925_v8 = vunpack.c.l.bf16 %v856_v39  ;;  %v919_v48 = vunpack.c.l.bf16 %v853_v42 }
 0x17c   :  { %v658_v36 = vpack.c.bf16 %v641_v2, %v640_v34  ;;  %v1281_v4 = vsel %vm211_vm13, 1.0, %v1669_v1  ;;  %v975_v63 = vunpack.c.l.bf16 %v881_v23  ;;  %v976_v55 = vunpack.c.h.bf16 %v881_v23  ;;  %v854_v34 = vld [vmem:[#allocation10 + $0x98] sm:$0xff] }
 0x17d   :  { %v216_v5 = vpack.c.bf16 %v1281_v4, %v1280_v57  ;;  %v926_v2 = vunpack.c.h.bf16 %v856_v39  ;;  %v928_v57 = vunpack.c.h.bf16 %v857_v49  ;;  %v850_v4 = vld [vmem:[#allocation10 + $0x78] sm:$0xff]  ;;  %v921_v23 = vunpack.c.l.bf16 %v854_v34 }
 0x17e   :  { %1400 = vmatmul.mubr.msk.bf16.vlgmr.msra.gmra.mxu0 %vm751_vm14, %v658_v36  ;;  %1088 = vmatprep.subr.mxu0 %v976_v55  ;;  %v927_v36 = vunpack.c.l.bf16 %v857_v49  ;;  %v914_v61 = vunpack.c.h.bf16 %v850_v4  ;;  %v913_v55 = vunpack.c.l.bf16 %v850_v4  ;;  %v882_v39 = vld [vmem:[#allocation10 + $0x178] sm:$0xff] }
 0x17f   :  { %1380 = vmatmul.mubr.msk.bf16.vlgmr.msra.gmra.mxu1 %vm269_vm15, %v216_v5  ;;  %1152 = vmatprep.mubr.f32.mxu0 %v1669_v1  ;;  %v851_v5 = vld [vmem:[#allocation10 + $0x80] sm:$0xff]  ;;  %v978_v49 = vunpack.c.h.bf16 %v882_v39 }
 0x180   :  { %1075 = vmatprep.mubr.f32.mxu1 %v1669_v1  ;;  %1012 = vmatpush1.msra.mxu1 %v973_v52  ;;  %v848_v52 = vld [vmem:[#allocation10 + $0x68] sm:$0xff]  ;;  %v915_v56 = vunpack.c.l.bf16 %v851_v5 }
 0x181   :  { %1089 = vmatpush1.msra.mxu0 %v975_v63  ;;  %1013 = vmatprep.subr.mxu1 %v968_v9  ;;  %v916_v63 = vunpack.c.h.bf16 %v851_v5  ;;  %v910_v9 = vunpack.c.h.bf16 %v848_v52 }
 0x182   :  { %1090 = vmatprep.subr.mxu0 %v970_v12  ;;  %1014 = vmatpush1.msra.mxu1 %v967_v11  ;;  %v908_v11 = vunpack.c.h.bf16 %v847_v50  ;;  %v909_v12 = vunpack.c.l.bf16 %v848_v52  ;;  %v977_v52 = vunpack.c.l.bf16 %v882_v39  ;;  %v840_v39 = vld [vmem:[#allocation10 + $0x28] sm:$0xff] }
 0x183   :  { %1091 = vmatpush1.msra.mxu0 %v969_v10  ;;  %1015 = vmatprep.subr.mxu1 %v962_v15  ;;  %v907_v10 = vunpack.c.l.bf16 %v847_v50  ;;  %v902_v15 = vunpack.c.h.bf16 %v844_v3 }
 0x184   :  { %1092 = vmatprep.subr.mxu0 %v964_v40  ;;  %1016 = vmatpush1.msra.mxu1 %v961_v21  ;;  %v904_v40 = vunpack.c.h.bf16 %v845_v58  ;;  %v901_v21 = vunpack.c.l.bf16 %v844_v3 }
 0x185   :  { %1093 = vmatpush1.msra.mxu0 %v963_v27  ;;  %1017 = vmatprep.subr.mxu1 %v956_v59  ;;  %v903_v27 = vunpack.c.l.bf16 %v845_v58  ;;  %v896_v59 = vunpack.c.h.bf16 %v841_v14  ;;  %v873_v58 = vld [vmem:[#allocation10 + $0x130] sm:$0xff] }
 0x186   :  { %1094 = vmatprep.subr.mxu0 %v958_v46  ;;  %1018 = vmatpush1.msra.mxu1 %v955_v62  ;;  %v898_v46 = vunpack.c.h.bf16 %v842_v7  ;;  %v895_v62 = vunpack.c.l.bf16 %v841_v14  ;;  %v806_v26 = vpop.xlane.xlu0 %805  ;;  %v870_v14 = vld [vmem:[#allocation10 + $0x118] sm:$0xff] }
 0x187   :  { %1095 = vmatpush1.msra.mxu0 %v957_v16  ;;  %1019 = vmatprep.subr.mxu1 %v950_v18  ;;  %v897_v16 = vunpack.c.l.bf16 %v842_v7  ;;  %v892_v18 = vunpack.c.h.bf16 %v839_v44  ;;  %v960_v7 = vunpack.c.h.bf16 %v873_v58 }
 0x188   :  { %1096 = vmatprep.subr.mxu0 %v952_v32  ;;  %1020 = vmatpush1.msra.mxu1 %v949_v37  ;;  %v889_v32 = vunpack.c.l.bf16 %v838_v43  ;;  %v891_v37 = vunpack.c.l.bf16 %v839_v44  ;;  %v953_v43 = vunpack.c.l.bf16 %v870_v14  ;;  %v864_v44 = vld [vmem:[#allocation10 + $0xe8] sm:$0xff] }
 0x189   :  { %1097 = vmatpush1.msra.mxu0 %v951_v51  ;;  %1021 = vmatprep.subr.mxu1 %v944_v20  ;;  %v884_v51 = vunpack.c.h.bf16 %v835_v0  ;;  %v858_v0 = vld [vmem:[#allocation10 + $0xb8] sm:$0xff] }
 0x18a   :  { %1098 = vmatprep.subr.mxu0 %v946_v24  ;;  %1022 = vmatpush1.msra.mxu1 %v943_v29 }
 0x18b   :  { %1099 = vmatpush1.msra.mxu0 %v945_v35  ;;  %1023 = vmatprep.subr.mxu1 %v938_v28  ;;  %v808_v28 = vmax.f32 %v806_v26, 1.0  ;;  %v846_v26 = vld [vmem:[#allocation10 + $0x58] sm:$0xff] }
 0x18c   :  { %1100 = vmatprep.subr.mxu0 %v940_v60  ;;  %1024 = vmatpush1.msra.mxu1 %v937_v30  ;;  %v836_v60 = vld [vmem:[#allocation10 + $0x8] sm:$0xff] }
 0x18d   :  { %1101 = vmatpush1.msra.mxu0 %v939_v38  ;;  %1025 = vmatprep.subr.mxu1 %v932_v54  ;;  %v885_v30 = vunpack.c.l.bf16 %v836_v60  ;;  %v886_v38 = vunpack.c.h.bf16 %v836_v60  ;;  %v843_v60 = vld [vmem:[#allocation10 + $0x40] sm:$0xff] }
 0x18e   :  { %1102 = vmatprep.subr.mxu0 %v934_v33  ;;  %1026 = vmatpush1.msra.mxu1 %v931_v13 }
 0x18f   :  { %1103 = vmatpush1.msra.mxu0 %v933_v41  ;;  %1027 = vmatprep.subr.mxu1 %v926_v2 }
 0x190   :  { %1104 = vmatprep.subr.mxu0 %v928_v57  ;;  %1028 = vmatpush1.msra.mxu1 %v925_v8 }
 0x191   :  { %1105 = vmatpush1.msra.mxu0 %v927_v36 }
 0x1a2   :  { %v2156_v25 = vpop.f32.mrf.mxu0 }
 0x1a4   :  { %v1363_v31 = vpop.f32.mrf.mxu0 }
 0x1a5   :  { %v920_v31 = vunpack.c.h.bf16 %v853_v42 }
 0x1a6   :  { %v2158_v45 = vpop.f32.mrf.mxu0 }
 0x1a7   :  { %1029 = vmatprep.subr.mxu1 %v920_v31 }
 0x1a8   :  { %v1364_v47 = vpop.f32.mrf.mxu0  ;;  %1030 = vmatpush1.msra.mxu1 %v919_v48 }
 0x1a9   :  { %v922_v47 = vunpack.c.h.bf16 %v854_v34  ;;  %1031 = vmatprep.subr.mxu1 %v914_v61  ;;  %v876_v61 = vld [vmem:[#allocation10 + $0x148] sm:$0xff] }
 0x1aa   :  { %1032 = vmatpush1.msra.mxu1 %v913_v55 }
 0x1ab   :  { %1106 = vmatprep.subr.mxu0 %v922_v47  ;;  %1033 = vmatprep.subr.mxu1 %v908_v11  ;;  %v966_v11 = vunpack.c.h.bf16 %v876_v61 }
 0x1ac   :  { %1107 = vmatpush1.msra.mxu0 %v921_v23  ;;  %1034 = vmatpush1.msra.mxu1 %v907_v10  ;;  %v803_v20 = vpop.xlane.xlu1 %802  ;;  %v879_v23 = vld [vmem:[#allocation10 + $0x160] sm:$0xff] }
 0x1ad   :  { %1108 = vmatprep.subr.mxu0 %v916_v63  ;;  %1035 = vmatprep.subr.mxu1 %v902_v15  ;;  %v807_v29 = vmax.f32 %v803_v20, 1.0  ;;  %v972_v55 = vunpack.c.h.bf16 %v879_v23  ;;  %v971_v3 = vunpack.c.l.bf16 %v879_v23 }
 0x1ae   :  { %1109 = vmatpush1.msra.mxu0 %v915_v56  ;;  %1036 = vmatpush1.msra.mxu1 %v901_v21  ;;  %v867_v21 = vld [vmem:[#allocation10 + $0x100] sm:$0xff] }
 0x1af   :  { %1110 = vmatprep.subr.mxu0 %v910_v9  ;;  %1037 = vmatprep.subr.mxu1 %v896_v59  ;;  %1525 = vrcp.f32 %v807_v29  ;;  %v947_v59 = vunpack.c.l.bf16 %v867_v21 }
 0x1b0   :  { %1111 = vmatpush1.msra.mxu0 %v909_v12  ;;  %1038 = vmatpush1.msra.mxu1 %v895_v62  ;;  %1527 = vrcp.f32 %v808_v28  ;;  %v965_v12 = vunpack.c.l.bf16 %v876_v61  ;;  %v942_v62 = vunpack.c.h.bf16 %v864_v44 }
 0x1b1   :  { %1112 = vmatprep.subr.mxu0 %v904_v40  ;;  %1039 = vmatprep.subr.mxu1 %v890_v17  ;;  %v959_v40 = vunpack.c.l.bf16 %v873_v58 }
 0x1b2   :  { %1113 = vmatpush1.msra.mxu0 %v903_v27  ;;  %1040 = vmatpush1.msra.mxu1 %v889_v32  ;;  %v954_v27 = vunpack.c.h.bf16 %v870_v14  ;;  %v855_v32 = vld [vmem:[#allocation10 + $0xa0] sm:$0xff] }
 0x1b3   :  { %1114 = vmatprep.subr.mxu0 %v898_v46  ;;  %1041 = vmatprep.subr.mxu1 %v884_v51  ;;  %v861_v46 = vld [vmem:[#allocation10 + $0xd0] sm:$0xff]  ;;  %v929_v51 = vunpack.c.l.bf16 %v858_v0  ;;  %v923_v20 = vunpack.c.l.bf16 %v855_v32 }
 0x1b4   :  { %1115 = vmatpush1.msra.mxu0 %v897_v16  ;;  %1042 = vmatpush1.msra.mxu1 %v883_v6  ;;  %v941_v16 = vunpack.c.l.bf16 %v864_v44  ;;  %v936_v17 = vunpack.c.h.bf16 %v861_v46  ;;  %v852_v6 = vld [vmem:[#allocation10 + $0x88] sm:$0xff] }
 0x1b5   :  { %1116 = vmatprep.subr.mxu0 %v892_v18  ;;  %1165 = vmatprep.subr.mxu1 %v978_v49  ;;  %v935_v18 = vunpack.c.l.bf16 %v861_v46  ;;  %v918_v29 = vunpack.c.h.bf16 %v852_v6  ;;  %v900_v49 = vunpack.c.h.bf16 %v843_v60 }
 0x1b6   :  { %1117 = vmatpush1.msra.mxu0 %v891_v37  ;;  %v930_v37 = vunpack.c.h.bf16 %v858_v0 }
 0x1b7   :  { %1118 = vmatprep.subr.mxu0 %v886_v38  ;;  %v905_v38 = vunpack.c.l.bf16 %v846_v26 }
 0x1b8   :  { %1119 = vmatpush1.msra.mxu0 %v885_v30  ;;  %v906_v30 = vunpack.c.h.bf16 %v846_v26 }
 0x1bc   :  { %v1526_v41 = vpop.eup %1525 }
 0x1bd   :  { %v1528_v4 = vpop.eup %1527 }
 0x22b   :  { %v721_v19 = vpop.f32.mrf.mxu0 }
 0x22d   :  { %v1389_v24 = vpop.f32.mrf.mxu0 }
 0x22e   :  { %v849_v24 = vld [vmem:[#allocation10 + $0x70] sm:$0xff] }
 0x22f   :  { %v724_v35 = vpop.f32.mrf.mxu0  ;;  %v911_v28 = vunpack.c.l.bf16 %v849_v24 }
 0x231   :  { %v1390_v53 = vpop.f32.mrf.mxu0 }
 0x232   :  { %v912_v53 = vunpack.c.h.bf16 %v849_v24 }
 0x23e   :  { %v793_v54 = vpop.f32.mrf.mxu0 }
 0x23f   :  { %v794_v33 = vadd.f32 %v793_v54, %v721_v19  ;;  %v311_v13 = vpop.f32.mrf.mxu1  ;;  %v924_v19 = vunpack.c.h.bf16 %v855_v32  ;;  %v899_v54 = vunpack.c.l.bf16 %v843_v60 }
 0x240   :  { %v1401_v42 = vpop.f32.mrf.mxu0  ;;  %823 = vrot.lane.b32.xlu1 %v311_v13, %s1678_s1  ;;  %v894_v13 = vunpack.c.h.bf16 %v840_v39 }
 0x241   :  { %v811_v34 = vmul.f32 %v1526_v41, %v794_v33  ;;  %v1381_v2 = vpop.f32.mrf.mxu1  ;;  %v837_v33 = vld [vmem:[#allocation10 + $0x10] sm:$0xff]  ;;  %v893_v41 = vunpack.c.l.bf16 %v840_v39 }
 0x242   :  { %v796_v57 = vpop.f32.mrf.mxu0  ;;  %v888_v42 = vunpack.c.h.bf16 %v837_v33  ;;  %v982_v2 = vshrl.u32 %v110_v22, 7 }
 0x243   :  { %v797_v8 = vadd.f32 %v796_v57, %v724_v35  ;;  %v314_v36 = vpop.f32.mrf.mxu1  ;;  %815 = vrot.lane.b32.xlu0 %v811_v34, %s1679_s8  ;;  %v917_v35 = vunpack.c.l.bf16 %v852_v6  ;;  %v887_v34 = vunpack.c.l.bf16 %v837_v33 }
 0x244   :  { %v1402_v5 = vpop.f32.mrf.mxu0  ;;  %v983_v57 = vsub.s32 0, %v982_v2 }
 0x245   :  { %v812_v31 = vmul.f32 %v1528_v4, %v797_v8  ;;  %v1382_v47 = vpop.f32.mrf.mxu1  ;;  %v991_v8 = vsub.s32 2, %v982_v2  ;;  %v987_v4 = vsub.s32 1, %v982_v2  ;;  %v995_v5 = vsub.s32 3, %v982_v2 }
 0x247   :  { %825 = vrot.lane.b32.xlu0 %v314_v36, %s1678_s1  ;;  %817 = vrot.lane.b32.xlu1 %v812_v31, %s1679_s8  ;;  %v979_v36 = vld [vmem:[%s2197_s10] sm:$0x3f]  ;;  %s1680_s10 = smov [#allocation11]  }
 0x248   :  { %v984_v31 = vrot.slane %v979_v36, %v983_v57  ;;  %v992_v47 = vrot.slane %v979_v36, %v991_v8  ;;  %v996_v23 = vrot.slane %v979_v36, %v995_v5  ;;  %s1259_s28 = sshll.u32 %s1680_s10, 4  ;;  %s1260_s28 = int_to_ptr.vmem [resolvable:$true] %s1259_s28 }
 0x249   :  { %s1629_s29 = scalar_lea.vmem %s1260_s28, 1536  ;;  %p1634_p12 = scmp.lt.s32.totalorder %s1260_s28, %s1260_s28 }
 0x24a   :  { %p1630_p11 = scmp.ne.s32.totalorder %s1260_s28, %s1629_s29  ;;  %p1635_p13 = scmp.lt.s32.totalorder %s1629_s29, %s1629_s29 }
 0x24c   :  { %p1636_p0 = por %p1635_p13, %p1634_p12 }
 0x24e   :  { %p1637_p1 = pnand %p1636_p0, %p1630_p11 }
 0x2b2   :  { %v824_v48 = vpop.permute.xlu1 %823 }
 0x2b5   :  { %v816_v50 = vpop.permute.xlu0 %815 }
 0x2b6   :  { %v830_v63 = vsel %vm829_vm0, %v2156_v25, %v816_v50 }
 0x2b7   :  { %v2163_v56 = vsel %vm832_vm2, %v830_v63, %v824_v48  ;;  %v988_v48 = vrot.slane %v979_v36, %v987_v4 }
 0x2b8   :  { %1076 = vmatmul.mubr.f32.vlgmr.msra.gmra.mxu1 %v2163_v56  ;;  %1153 = vmatmul.mubr.f32.vlgmr.msra.gmra.mxu0 %v2163_v56 }
 0x2b9   :  { %1166 = vmatpush1.msra.mxu1 %v977_v52  ;;  %v826_v9 = vpop.permute.xlu0 %825  ;;  %v818_v10 = vpop.permute.xlu1 %817  ;;  %1081 = vmatprep.mubr.f32.mxu1 %v1669_v1 }
 0x2ba   :  { %1167 = vmatprep.subr.mxu1 %v972_v55  ;;  %v831_v25 = vsel %vm829_vm0, %v2158_v45, %v818_v10  ;;  %1158 = vmatprep.mubr.f32.mxu0 %v1669_v1  ;;  %v948_v45 = vunpack.c.h.bf16 %v867_v21 }
 0x2bb   :  { %1168 = vmatpush1.msra.mxu1 %v971_v3  ;;  %v2172_v15 = vsel %vm832_vm2, %v831_v25, %v826_v9 }
 0x2bc   :  { %1169 = vmatprep.subr.mxu1 %v966_v11  ;;  %1082 = vmatmul.mubr.f32.gmra.mxu1 %v2172_v15 }
 0x2bd   :  { %1159 = vmatmul.mubr.f32.gmra.mxu0 %v2172_v15  ;;  %1170 = vmatpush1.msra.mxu1 %v965_v12 }
 0x2be   :  { %1171 = vmatprep.subr.mxu1 %v960_v7  ;;  %1229 = vmatprep.mubr.f32.mxu1 %v1669_v1  ;;  %v999_v7 = vsub.s32 4, %v982_v2 }
 0x2bf   :  { %1172 = vmatpush1.msra.mxu1 %v959_v40 }
 0x2c0   :  { %1173 = vmatprep.subr.mxu1 %v954_v27  ;;  %v1000_v40 = vrot.slane %v979_v36, %v999_v7 }
 0x2c1   :  { %1174 = vmatpush1.msra.mxu1 %v953_v43 }
 0x2c2   :  { %1175 = vmatprep.subr.mxu1 %v948_v45 }
 0x2c3   :  { %1176 = vmatpush1.msra.mxu1 %v947_v59 }
 0x2c4   :  { %1177 = vmatprep.subr.mxu1 %v942_v62 }
 0x2c5   :  { %1178 = vmatpush1.msra.mxu1 %v941_v16 }
 0x2c6   :  { %1179 = vmatprep.subr.mxu1 %v936_v17 }
 0x2c7   :  { %1180 = vmatpush1.msra.mxu1 %v935_v18 }
 0x2c8   :  { %1181 = vmatprep.subr.mxu1 %v930_v37 }
 0x2c9   :  { %1182 = vmatpush1.msra.mxu1 %v929_v51 }
 0x2ca   :  { %1183 = vmatprep.subr.mxu1 %v924_v19 }
 0x2cb   :  { %1184 = vmatpush1.msra.mxu1 %v923_v20 }
 0x2cc   :  { %1185 = vmatprep.subr.mxu1 %v918_v29 }
 0x2cd   :  { %1186 = vmatpush1.msra.mxu1 %v917_v35 }
 0x2ce   :  { %1187 = vmatprep.subr.mxu1 %v912_v53 }
 0x2cf   :  { %1188 = vmatpush1.msra.mxu1 %v911_v28 }
 0x2d0   :  { %1189 = vmatprep.subr.mxu1 %v906_v30 }
 0x2d1   :  { %1190 = vmatpush1.msra.mxu1 %v905_v38 }
 0x2d2   :  { %1191 = vmatprep.subr.mxu1 %v900_v49 }
 0x2d3   :  { %1192 = vmatpush1.msra.mxu1 %v899_v54 }
 0x2d4   :  { %1193 = vmatprep.subr.mxu1 %v894_v13 }
 0x2d5   :  { %1194 = vmatpush1.msra.mxu1 %v893_v41 }
 0x2d6   :  { %1195 = vmatprep.subr.mxu1 %v888_v42 }
 0x2d7   :  { %1196 = vmatpush1.msra.mxu1 %v887_v34 }
 0x2d8   :  { %1230 = vmatmul.mubr.f32.vlgmr.msra.gmra.mxu1 %v2163_v56 }
 0x2d9   :  { %1235 = vmatprep.mubr.f32.mxu1 %v1669_v1 }
 0x2dc   :  { %1236 = vmatmul.mubr.f32.gmra.mxu1 %v2172_v15  ;;  %v1003_v15 = vsub.s32 5, %v982_v2 }
 0x2de   :  { %v1004_v21 = vrot.slane %v979_v36, %v1003_v15 }
 0x378   :  { %v1077_v50 = vpop.f32.mrf.mxu1  ;;  %v1154_v52 = vpop.f32.mrf.mxu0 }
 0x379   :  { %v1078_v61 = vadd.f32 %v1077_v50, %v984_v31  ;;  %v1155_v1 = vadd.f32 %v1154_v52, %v992_v47 }
 0x37a   :  { %v1079_v63 = vpop.f32.mrf.mxu1  ;;  %v1156_v55 = vpop.f32.mrf.mxu0 }
 0x37b   :  { %1242 = vst [vmem:[#allocation11] sm:$0xff] %v1078_v61  ;;  %1244 = vst [vmem:[#allocation11 + $0x10] sm:$0xff] %v1155_v1  ;;  %v1080_v22 = vadd.f32 %v1079_v63, %v988_v48  ;;  %v1157_v56 = vadd.f32 %v1156_v55, %v996_v23 }
 0x37c   :  { %v1083_v3 = vpop.f32.mrf.mxu1 }
 0x37d   :  { %1243 = vst [vmem:[#allocation11 + $0x8] sm:$0xff] %v1080_v22  ;;  %1245 = vst [vmem:[#allocation11 + $0x18] sm:$0xff] %v1157_v56  ;;  %v1084_v58 = vadd.f32 %v1083_v3, %v984_v31  ;;  %v1160_v11 = vpop.f32.mrf.mxu0 }
 0x37e   :  { %v1161_v9 = vadd.f32 %v1160_v11, %v992_v47  ;;  %v1085_v10 = vpop.f32.mrf.mxu1 }
 0x37f   :  { %1248 = vst [vmem:[#allocation11 + $0x30] sm:$0xff] %v1084_v58  ;;  %v1086_v12 = vadd.f32 %v1085_v10, %v988_v48  ;;  %v1162_v14 = vpop.f32.mrf.mxu0 }
 0x380   :  { %1250 = vst [vmem:[#allocation11 + $0x40] sm:$0xff] %v1161_v9  ;;  %v1163_v25 = vadd.f32 %v1162_v14, %v996_v23 }
 0x381   :  { %1249 = vst [vmem:[#allocation11 + $0x38] sm:$0xff] %v1086_v12 }
 0x382   :  { %1251 = vst [vmem:[#allocation11 + $0x48] sm:$0xff] %v1163_v25 }
 0x398   :  { %v1231_v27 = vpop.f32.mrf.mxu1 }
 0x399   :  { %v1232_v43 = vadd.f32 %v1231_v27, %v1000_v40 }
 0x39a   :  { %v1233_v44 = vpop.f32.mrf.mxu1 }
 0x39b   :  { %1246 = vst [vmem:[#allocation11 + $0x20] sm:$0xff] %v1232_v43  ;;  %v1234_v45 = vadd.f32 %v1233_v44, %v1004_v21 }
 0x39c   :  { %v1237_v59 = vpop.f32.mrf.mxu1 }
 0x39d   :  { %1247 = vst [vmem:[#allocation11 + $0x28] sm:$0xff] %v1234_v45  ;;  %v1238_v46 = vadd.f32 %v1237_v59, %v1000_v40 }
 0x39e   :  { %v1239_v62 = vpop.f32.mrf.mxu1 }
 0x39f   :  { %1252 = vst [vmem:[#allocation11 + $0x50] sm:$0xff] %v1238_v46  ;;  %v1240_v16 = vadd.f32 %v1239_v62, %v1004_v21 }
 0x3a1   :  { %1253 = vst [vmem:[#allocation11 + $0x58] sm:$0xff] %v1240_v16 }
 0x3a2   :  { %1640 = shalt.err (!%p1637_p1)
}
 0x3a3   :  { %s1681_s30 = smov 768   ;;  %s1682_s5 = smov 48  }
 0x3a4   :  { %1265 = dma.vmem_to_hbm [thread:$0]  %s1260_s28, 1536, %s2198_s11, [#allocation4], %s1681_s30, %s1681_s30, %s1682_s5  }
 0x3a5   :  { %1655 = dma.done.wait [#allocation4], 1536  }
 0x3a6   :  { %1656 = vsyncadd [#allocation4], 4294965760 }
 0x3a7   :  { %1269 = vsyncpa [#allocation3], 1 }
 0x3a8   :  { %1270 = vsyncpa [#allocation6], 1 }
 0x3a9   :  { %1271 = vsyncpa [#allocation9], 1 }
 0x3aa   :  { %1272 = vsyncpa [#allocation4], 1 }

</bundles_post_ra>
